<compile_context>
chip_gen: v7x
topology: tpu7x:2x2x1
jax: 0.10.0
libtpu: 0.0.40
codegen_flags: <defaults>
</compile_context>

<pallas_src>
import functools
import math

import jax
import jax.numpy as jnp
from jax.experimental import pallas as pl
from jax.experimental.pallas import tpu as pltpu

_NEG_INF = -1e30


def _erf(x):
    # Abramowitz & Stegun 7.1.26 rational approximation of erf
    # (max abs error ~1.5e-7), matches torch.nn.GELU() (exact/erf variant).
    p = 0.3275911
    a1, a2, a3, a4, a5 = (0.254829592, -0.284496736, 1.421413741,
                          -1.453152027, 1.061405429)
    sgn = jnp.where(x >= 0.0, 1.0, -1.0)
    ax = jnp.abs(x)
    t = 1.0 / (1.0 + p * ax)
    poly = ((((a5 * t + a4) * t + a3) * t + a2) * t + a1) * t
    return sgn * (1.0 - poly * jnp.exp(-ax * ax))


def _gelu_exact(x):
    return 0.5 * x * (1.0 + _erf(x * (1.0 / math.sqrt(2.0))))


def _softmax_rows(x, exact_div):
    m = jnp.max(x, axis=-1, keepdims=True)
    e = jnp.exp(x - m)                       # masked entries underflow to exactly 0
    s = jnp.sum(e, axis=-1, keepdims=True)
    if exact_div:                            # f32 parity path
        return e / s
    return e * pl.reciprocal(s, approx=True)  # EUP slot, bf16 fast path


def agent_attention_kernel(x_ref, wqkv_ref, wp1_ref, bp1_ref, m2_ref, wp2_ref,
                           bp2_ref, colmask_ref, gsel_ref, mask_ak_ref,
                           mask_qa_ref, rsel_ref, wproj_ref, bproj_ref,
                           out_ref, rep_ref, *, dim, compute_dtype, exact_div):
    c = dim
    f32 = jnp.float32
    cdt = compute_dtype

    def mxu(a, b, transpose_b=False):        # MXU matmul, f32 accumulation
        dims = (((1,), (1,)), ((), ())) if transpose_b else (((1,), (0,)), ((), ()))
        return jax.lax.dot_general(a, b, dims, preferred_element_type=f32)

    # ---- fused QKV: one matmul over the whole (tb*n, c) slab, cast once.
    xf = x_ref[...].astype(cdt)
    qkv = mxu(xf, wqkv_ref[...]).astype(cdt)              # (tb*n, 3c)
    q = qkv[:, :c]
    k = qkv[:, c:2 * c]
    v = qkv[:, 2 * c:]

    # ---- pool stage 1 (token-wise), GELU in f32.
    h1 = _gelu_exact(mxu(q, wp1_ref[...]) + bp1_ref[...])  # (tb*n, c2) f32

    # ---- per-window token mean, each window replicated agent_num times along
    #      rows.  Kept fully f32 so 1/n means stay exact for any n.
    h_rep = mxu(m2_ref[...], h1)                            # (tb*A, c2) f32

    # ---- agent tokens: full-lane matmul against natural wp2, then a constant
    #      column-gather (mask + stacked identity) relayouts to (tb*A, c).
    flat = mxu(h_rep.astype(cdt), wp2_ref[...]) + bp2_ref[...]       # (tb*A, A*c)
    agent = mxu((flat * colmask_ref[...]).astype(cdt), gsel_ref[...])  # (tb*A, c)

    scale = c ** -0.5                         # head_dim == c (num_heads == 1)
    agent_s = (agent * scale).astype(cdt)     # scaled + cast once, reused twice

    # ---- agent attention, block-diagonal over windows via an additive mask
    #      (cross-window softmax weights are exactly 0).
    s1 = mxu(agent_s, k, transpose_b=True) + mask_ak_ref[...]        # (tb*A, tb*n)
    p1 = _softmax_rows(s1, exact_div)
    agent_v = mxu(p1.astype(cdt), v)                                 # (tb*A, c)

    # ---- query attention.
    s2 = mxu(q, agent_s, transpose_b=True) + mask_qa_ref[...]        # (tb*n, tb*A)
    p2 = _softmax_rows(s2, exact_div)
    y = mxu(p2.astype(cdt), agent_v.astype(cdt))                     # (tb*n, c)

    out = mxu(y.astype(cdt), wproj_ref[...]) + bproj_ref[...]
    out_ref[...] = out.astype(out_ref.dtype)

    # ---- agent_rep: one exact f32 matmul collapses the (exactly zero)
    #      cross-window columns of p1 into per-window (A, n) blocks.
    rep_ref[...] = mxu(p1, rsel_ref[...]).astype(rep_ref.dtype)      # (tb*A, n)


def _pick_windows_per_block(b, n, agent_num):
    # grid of 1 is always block-shape-legal (blocks == full arrays).
    legal = [b]
    for cand in range(1, b):
        if b % cand == 0 and (cand * n) % 8 == 0 and (cand * agent_num) % 8 == 0:
            legal.append(cand)
    # Smallest tb reaching >=128 MXU rows (keeps extra grid steps for v7x's two
    # TCs when b allows it); otherwise the largest tb under 256 rows; otherwise
    # the smallest legal tb.
    good = sorted(t for t in legal if 128 <= t * n <= 256)
    if good:
        return good[0]
    under = sorted(t for t in legal if t * n <= 256)
    return under[-1] if under else min(legal)


def agent_attention(x, params, *, agent_num=4, num_heads=1,
                    windows_per_block=None, compute_dtype=jnp.bfloat16):
    """Pallas forward of AgentAttention (qkv_bias=False, drops=0, attn_1/2=None)."""
    assert num_heads == 1, "PyTorch forward is only size-consistent for num_heads == 1"
    b, n, c = x.shape
    A = agent_num
    c2 = c // 2
    f32 = jnp.float32
    cdt = compute_dtype
    exact_div = jnp.dtype(cdt) == jnp.dtype(jnp.float32)

    if windows_per_block is None:
        tb = _pick_windows_per_block(b, n, A)
    else:
        tb = windows_per_block
        assert b % tb == 0
    grid = b // tb

    # --------------- host-side constants (fetched once: constant index maps) ----
    wqkv = params["wqkv"].astype(cdt)                      # fused (c, 3c)
    wp1 = params["wp1"].astype(cdt)
    bp1 = params["bp1"].reshape(1, c2).astype(f32)
    wp2 = params["wp2"].astype(cdt)                        # natural (c2, A*c)
    bp2 = params["bp2"].reshape(1, A * c).astype(f32)
    wproj = params["wproj"].astype(cdt)
    bproj = params["bproj"].reshape(1, c).astype(f32)

    # per-window token-mean matrix, rows replicated A times (exact 1/n in f32).
    win_a = jnp.arange(tb * A) // A
    win_n = jnp.arange(tb * n) // n
    m2 = jnp.where(win_a[:, None] == win_n[None, :], 1.0 / n, 0.0).astype(f32)

    # column-gather constants: row r keeps the (r % A)-th c-wide block of the
    # (tb*A, A*c) pooled output; gsel stacks A identity(c) blocks.
    agt = jnp.arange(tb * A) % A
    blk = jnp.arange(A * c) // c
    colmask = (agt[:, None] == blk[None, :]).astype(f32)   # (tb*A, A*c)
    gsel = jnp.tile(jnp.eye(c, dtype=cdt), (A, 1))         # (A*c, c)

    # additive block-diagonal attention masks (cross-window scores -> -inf).
    mask_ak = jnp.where(win_a[:, None] == win_n[None, :], 0.0, _NEG_INF).astype(f32)
    mask_qa = mask_ak.T                                    # (tb*n, tb*A)

    # stacked identity that collapses the (exactly zero) cross-window p1 columns.
    rsel = jnp.tile(jnp.eye(n, dtype=f32), (tb, 1))        # (tb*n, n)

    x2 = x.reshape(b * n, c)

    kernel = functools.partial(agent_attention_kernel, dim=c,
                               compute_dtype=cdt, exact_div=exact_div)
    out_shapes = (
        jax.ShapeDtypeStruct((b * n, c), x.dtype),
        jax.ShapeDtypeStruct((b * A, n), x.dtype),
    )

    def const(shape):
        return pl.BlockSpec(shape, lambda i: (0, 0))

    grid_spec = pltpu.PrefetchScalarGridSpec(
        num_scalar_prefetch=0,
        grid=(grid,),
        in_specs=[
            pl.BlockSpec((tb * n, c), lambda i: (i, 0)),   # x slab
            const((c, 3 * c)),                             # wqkv (fused)
            const((c, c2)),                                # wp1
            const((1, c2)),                                # bp1
            const((tb * A, tb * n)),                       # m2 (f32 mean matrix)
            const((c2, A * c)),                            # wp2 (natural layout)
            const((1, A * c)),                             # bp2
            const((tb * A, A * c)),                        # colmask
            const((A * c, c)),                             # gsel (stacked identity)
            const((tb * A, tb * n)),                       # additive mask agent->tokens
            const((tb * n, tb * A)),                       # additive mask tokens->agent
            const((tb * n, n)),                            # rsel (rep stacked identity)
            const((c, c)),                                 # wproj
            const((1, c)),                                 # bproj
        ],
        out_specs=(
            pl.BlockSpec((tb * n, c), lambda i: (i, 0)),   # out slab
            pl.BlockSpec((tb * A, n), lambda i: (i, 0)),   # agent_rep (2-D, lane-denser)
        ),
    )

    out2, rep2 = pl.pallas_call(
        kernel,
        out_shape=out_shapes,
        grid_spec=grid_spec,
        compiler_params=pltpu.CompilerParams(
            dimension_semantics=("parallel",),
            vmem_limit_bytes=48 * 1024 * 1024),
    )(x2, wqkv, wp1, bp1, m2, wp2, bp2, colmask, gsel,
      mask_ak, mask_qa, rsel, wproj, bproj)

    return out2.reshape(b, n, c), rep2.reshape(b, 1, A, n)


def reference(x, params, *, agent_num=4):
    """Pure-JAX replica of the PyTorch forward (num_heads == 1)."""
    b, n, c = x.shape
    A = agent_num
    qkv = x @ params["wqkv"]
    q, k, v = qkv[..., :c], qkv[..., c:2 * c], qkv[..., 2 * c:]
    h1 = jax.nn.gelu(q @ params["wp1"] + params["bp1"], approximate=False)
    agent_full = h1 @ params["wp2"] + params["bp2"]                        # (b, n, A*c)
    agent = agent_full.mean(axis=1).reshape(b, A, 1, c).transpose(0, 2, 1, 3)  # (b,1,A,c)
    qh = q.reshape(b, n, 1, c).transpose(0, 2, 1, 3)
    kh = k.reshape(b, n, 1, c).transpose(0, 2, 1, 3)
    vh = v.reshape(b, n, 1, c).transpose(0, 2, 1, 3)
    scale = c ** -0.5
    agent_attn = jax.nn.softmax(
        jnp.einsum("bhac,bhnc->bhan", agent * scale, kh), axis=-1)
    agent_v = jnp.einsum("bhan,bhnc->bhac", agent_attn, vh)
    q_attn = jax.nn.softmax(
        jnp.einsum("bhnc,bhac->bhna", qh * scale, agent), axis=-1)
    y = jnp.einsum("bhna,bhac->bhnc", q_attn, agent_v)
    y = y.transpose(0, 2, 1, 3).reshape(b, n, c)
    out = y @ params["wproj"] + params["bproj"]
    return out, agent_attn


if __name__ == "__main__":
    b, n, c = 8, 16, 32     # b = num_windows*B, n is a perfect square (h = w = 4)
    A = 4                   # agent_num
    c2 = c // 2

    key = jax.random.PRNGKey(0)
    keys = jax.random.split(key, 8)
    s = 0.05
    params = {
        "wqkv": s * jax.random.normal(keys[0], (c, 3 * c), jnp.float32),
        "wp1": s * jax.random.normal(keys[1], (c, c2), jnp.float32),
        "bp1": s * jax.random.normal(keys[2], (c2,), jnp.float32),
        "wp2": s * jax.random.normal(keys[3], (c2, A * c), jnp.float32),
        "bp2": s * jax.random.normal(keys[4], (A * c,), jnp.float32),
        "wproj": s * jax.random.normal(keys[5], (c, c), jnp.float32),
        "bproj": s * jax.random.normal(keys[6], (c,), jnp.float32),
    }
    x = jax.random.normal(keys[7], (b, n, c), jnp.float32)

    ref_out, ref_rep = reference(x, params, agent_num=A)

    # f32 MXU-operand path (exact-parity path: exact softmax divide)
    out, rep = agent_attention(x, params, agent_num=A, compute_dtype=jnp.float32)
    jax.block_until_ready((out, rep))
    assert out.shape == (b, n, c), out.shape
    assert rep.shape == (b, 1, A, n), rep.shape
    assert jnp.allclose(out, ref_out, atol=1e-3, rtol=1e-3)
    assert jnp.allclose(rep, ref_rep, atol=1e-3, rtol=1e-3)

    # bf16 MXU-operand fast path (default; f32 accumulation, f32 GELU/softmax)
    out16, rep16 = agent_attention(x, params, agent_num=A)
    jax.block_until_ready((out16, rep16))
    assert jnp.allclose(out16, ref_out, atol=2e-2, rtol=2e-1)
    assert jnp.allclose(rep16, ref_rep, atol=2e-2, rtol=2e-1)

    print("KERNEL_OK")
</pallas_src>

<mosaic_0001>
module attributes {stable_mosaic.version = 11 : i64} {
  func.func @agent_attention_kernel(%arg0: i32, %arg1: memref<128x32xf32, #tpu.memory_space<vmem>>, %arg2: memref<32x96xf32, #tpu.memory_space<vmem>>, %arg3: memref<32x16xf32, #tpu.memory_space<vmem>>, %arg4: memref<1x16xf32, #tpu.memory_space<vmem>>, %arg5: memref<32x128xf32, #tpu.memory_space<vmem>>, %arg6: memref<16x128xf32, #tpu.memory_space<vmem>>, %arg7: memref<1x128xf32, #tpu.memory_space<vmem>>, %arg8: memref<32x128xf32, #tpu.memory_space<vmem>>, %arg9: memref<128x32xf32, #tpu.memory_space<vmem>>, %arg10: memref<32x128xf32, #tpu.memory_space<vmem>>, %arg11: memref<128x32xf32, #tpu.memory_space<vmem>>, %arg12: memref<128x16xf32, #tpu.memory_space<vmem>>, %arg13: memref<32x32xf32, #tpu.memory_space<vmem>>, %arg14: memref<1x32xf32, #tpu.memory_space<vmem>>, %arg15: memref<128x32xf32, #tpu.memory_space<vmem>>, %arg16: memref<32x16xf32, #tpu.memory_space<vmem>>) attributes {dimension_semantics = [#tpu.dimension_semantics<parallel>], iteration_bounds = array<i64: 1>, scalar_prefetch = 0 : i64, scratch_operands = 0 : i64, tpu.core_type = #tpu.core_type<tc>, window_params = [{transform_indices = @transform_0, window_bounds = array<i64: 128, 32>}, {pipeline_mode = #tpu.pipeline_mode<synchronous>, transform_indices = @transform_1, window_bounds = array<i64: 32, 96>}, {pipeline_mode = #tpu.pipeline_mode<synchronous>, transform_indices = @transform_2, window_bounds = array<i64: 32, 16>}, {pipeline_mode = #tpu.pipeline_mode<synchronous>, transform_indices = @transform_3, window_bounds = array<i64: 1, 16>}, {pipeline_mode = #tpu.pipeline_mode<synchronous>, transform_indices = @transform_4, window_bounds = array<i64: 32, 128>}, {pipeline_mode = #tpu.pipeline_mode<synchronous>, transform_indices = @transform_5, window_bounds = array<i64: 16, 128>}, {pipeline_mode = #tpu.pipeline_mode<synchronous>, transform_indices = @transform_6, window_bounds = array<i64: 1, 128>}, {pipeline_mode = #tpu.pipeline_mode<synchronous>, transform_indices = @transform_7, window_bounds = array<i64: 32, 128>}, {pipeline_mode = #tpu.pipeline_mode<synchronous>, transform_indices = @transform_8, window_bounds = array<i64: 128, 32>}, {pipeline_mode = #tpu.pipeline_mode<synchronous>, transform_indices = @transform_9, window_bounds = array<i64: 32, 128>}, {pipeline_mode = #tpu.pipeline_mode<synchronous>, transform_indices = @transform_10, window_bounds = array<i64: 128, 32>}, {pipeline_mode = #tpu.pipeline_mode<synchronous>, transform_indices = @transform_11, window_bounds = array<i64: 128, 16>}, {pipeline_mode = #tpu.pipeline_mode<synchronous>, transform_indices = @transform_12, window_bounds = array<i64: 32, 32>}, {pipeline_mode = #tpu.pipeline_mode<synchronous>, transform_indices = @transform_13, window_bounds = array<i64: 1, 32>}, {transform_indices = @transform_14, window_bounds = array<i64: 128, 32>}, {transform_indices = @transform_15, window_bounds = array<i64: 32, 16>}]} {
    %c0 = arith.constant 0 : index
    %c0_0 = arith.constant 0 : index
    %0 = vector.load %arg1[%c0, %c0_0] : memref<128x32xf32, #tpu.memory_space<vmem>>, vector<128x32xf32>
    %c0_1 = arith.constant 0 : index
    %c0_2 = arith.constant 0 : index
    %1 = vector.load %arg2[%c0_1, %c0_2] : memref<32x96xf32, #tpu.memory_space<vmem>>, vector<32x96xf32>
    %cst = arith.constant dense<0.000000e+00> : vector<128x96xf32>
    %2 = tpu.matmul %0, %1, %cst {dimension_numbers = #tpu.dot_dimension_numbers<[1], [0], [0], [1], [0, 0, 1, 1], [], []>} : vector<128x32xf32>, vector<32x96xf32>, vector<128x96xf32> -> vector<128x96xf32>
    %3 = vector.extract_strided_slice %2 {offsets = [0, 0], sizes = [128, 32], strides = [1, 1]} : vector<128x96xf32> to vector<128x32xf32>
    %4 = vector.extract_strided_slice %2 {offsets = [0, 32], sizes = [128, 32], strides = [1, 1]} : vector<128x96xf32> to vector<128x32xf32>
    %5 = vector.extract_strided_slice %2 {offsets = [0, 64], sizes = [128, 32], strides = [1, 1]} : vector<128x96xf32> to vector<128x32xf32>
    %c0_3 = arith.constant 0 : index
    %c0_4 = arith.constant 0 : index
    %6 = vector.load %arg3[%c0_3, %c0_4] : memref<32x16xf32, #tpu.memory_space<vmem>>, vector<32x16xf32>
    %cst_5 = arith.constant dense<0.000000e+00> : vector<128x16xf32>
    %7 = tpu.matmul %3, %6, %cst_5 {dimension_numbers = #tpu.dot_dimension_numbers<[1], [0], [0], [1], [0, 0, 1, 1], [], []>} : vector<128x32xf32>, vector<32x16xf32>, vector<128x16xf32> -> vector<128x16xf32>
    %c0_6 = arith.constant 0 : index
    %c0_7 = arith.constant 0 : index
    %8 = vector.load %arg4[%c0_6, %c0_7] : memref<1x16xf32, #tpu.memory_space<vmem>>, vector<1x16xf32>
    %9 = vector.broadcast %8 : vector<1x16xf32> to vector<128x16xf32>
    %10 = arith.addf %7, %9 : vector<128x16xf32>
    %cst_8 = arith.constant 5.000000e-01 : f32
    %11 = vector.broadcast %cst_8 : f32 to vector<128x16xf32>
    %12 = arith.mulf %11, %10 : vector<128x16xf32>
    %cst_9 = arith.constant 0.707106769 : f32
    %13 = vector.broadcast %cst_9 : f32 to vector<128x16xf32>
    %14 = arith.mulf %10, %13 : vector<128x16xf32>
    %cst_10 = arith.constant 0.000000e+00 : f32
    %15 = vector.broadcast %cst_10 : f32 to vector<128x16xf32>
    %16 = arith.cmpf oge, %14, %15 : vector<128x16xf32>
    %cst_11 = arith.constant 1.000000e+00 : f32
    %cst_12 = arith.constant -1.000000e+00 : f32
    %17 = vector.broadcast %cst_11 : f32 to vector<128x16xf32>
    %18 = vector.broadcast %cst_12 : f32 to vector<128x16xf32>
    %19 = arith.select %16, %17, %18 : vector<128x16xi1>, vector<128x16xf32>
    %20 = math.absf %14 : vector<128x16xf32>
    %cst_13 = arith.constant 0.327591091 : f32
    %21 = vector.broadcast %cst_13 : f32 to vector<128x16xf32>
    %22 = arith.mulf %21, %20 : vector<128x16xf32>
    %cst_14 = arith.constant 1.000000e+00 : f32
    %23 = vector.broadcast %cst_14 : f32 to vector<128x16xf32>
    %24 = arith.addf %23, %22 : vector<128x16xf32>
    %cst_15 = arith.constant 1.000000e+00 : f32
    %25 = vector.broadcast %cst_15 : f32 to vector<128x16xf32>
    %26 = arith.divf %25, %24 : vector<128x16xf32>
    %cst_16 = arith.constant 1.06140542 : f32
    %27 = vector.broadcast %cst_16 : f32 to vector<128x16xf32>
    %28 = arith.mulf %27, %26 : vector<128x16xf32>
    %cst_17 = arith.constant -1.45315206 : f32
    %29 = vector.broadcast %cst_17 : f32 to vector<128x16xf32>
    %30 = arith.addf %28, %29 : vector<128x16xf32>
    %31 = arith.mulf %30, %26 : vector<128x16xf32>
    %cst_18 = arith.constant 1.42141378 : f32
    %32 = vector.broadcast %cst_18 : f32 to vector<128x16xf32>
    %33 = arith.addf %31, %32 : vector<128x16xf32>
    %34 = arith.mulf %33, %26 : vector<128x16xf32>
    %cst_19 = arith.constant -0.284496725 : f32
    %35 = vector.broadcast %cst_19 : f32 to vector<128x16xf32>
    %36 = arith.addf %34, %35 : vector<128x16xf32>
    %37 = arith.mulf %36, %26 : vector<128x16xf32>
    %cst_20 = arith.constant 0.254829586 : f32
    %38 = vector.broadcast %cst_20 : f32 to vector<128x16xf32>
    %39 = arith.addf %37, %38 : vector<128x16xf32>
    %40 = arith.mulf %39, %26 : vector<128x16xf32>
    %cst_21 = arith.constant 0.000000e+00 : f32
    %41 = vector.broadcast %cst_21 : f32 to vector<128x16xf32>
    %42 = arith.subf %41, %20 : vector<128x16xf32>
    %43 = arith.mulf %42, %20 : vector<128x16xf32>
    %44 = math.exp %43 : vector<128x16xf32>
    %45 = arith.mulf %40, %44 : vector<128x16xf32>
    %cst_22 = arith.constant 1.000000e+00 : f32
    %46 = vector.broadcast %cst_22 : f32 to vector<128x16xf32>
    %47 = arith.subf %46, %45 : vector<128x16xf32>
    %48 = arith.mulf %19, %47 : vector<128x16xf32>
    %cst_23 = arith.constant 1.000000e+00 : f32
    %49 = vector.broadcast %cst_23 : f32 to vector<128x16xf32>
    %50 = arith.addf %49, %48 : vector<128x16xf32>
    %51 = arith.mulf %12, %50 : vector<128x16xf32>
    %c0_24 = arith.constant 0 : index
    %c0_25 = arith.constant 0 : index
    %52 = vector.load %arg5[%c0_24, %c0_25] : memref<32x128xf32, #tpu.memory_space<vmem>>, vector<32x128xf32>
    %cst_26 = arith.constant dense<0.000000e+00> : vector<32x16xf32>
    %53 = tpu.matmul %52, %51, %cst_26 {dimension_numbers = #tpu.dot_dimension_numbers<[1], [0], [0], [1], [0, 0, 1, 1], [], []>} : vector<32x128xf32>, vector<128x16xf32>, vector<32x16xf32> -> vector<32x16xf32>
    %c0_27 = arith.constant 0 : index
    %c0_28 = arith.constant 0 : index
    %54 = vector.load %arg6[%c0_27, %c0_28] : memref<16x128xf32, #tpu.memory_space<vmem>>, vector<16x128xf32>
    %cst_29 = arith.constant dense<0.000000e+00> : vector<32x128xf32>
    %55 = tpu.matmul %53, %54, %cst_29 {dimension_numbers = #tpu.dot_dimension_numbers<[1], [0], [0], [1], [0, 0, 1, 1], [], []>} : vector<32x16xf32>, vector<16x128xf32>, vector<32x128xf32> -> vector<32x128xf32>
    %c0_30 = arith.constant 0 : index
    %c0_31 = arith.constant 0 : index
    %56 = vector.load %arg7[%c0_30, %c0_31] : memref<1x128xf32, #tpu.memory_space<vmem>>, vector<1x128xf32>
    %57 = vector.broadcast %56 : vector<1x128xf32> to vector<32x128xf32>
    %58 = arith.addf %55, %57 : vector<32x128xf32>
    %c0_32 = arith.constant 0 : index
    %c0_33 = arith.constant 0 : index
    %59 = vector.load %arg8[%c0_32, %c0_33] : memref<32x128xf32, #tpu.memory_space<vmem>>, vector<32x128xf32>
    %60 = arith.mulf %58, %59 : vector<32x128xf32>
    %c0_34 = arith.constant 0 : index
    %c0_35 = arith.constant 0 : index
    %61 = vector.load %arg9[%c0_34, %c0_35] : memref<128x32xf32, #tpu.memory_space<vmem>>, vector<128x32xf32>
    %cst_36 = arith.constant dense<0.000000e+00> : vector<32x32xf32>
    %62 = tpu.matmul %60, %61, %cst_36 {dimension_numbers = #tpu.dot_dimension_numbers<[1], [0], [0], [1], [0, 0, 1, 1], [], []>} : vector<32x128xf32>, vector<128x32xf32>, vector<32x32xf32> -> vector<32x32xf32>
    %cst_37 = arith.constant 0.176776692 : f32
    %63 = vector.broadcast %cst_37 : f32 to vector<32x32xf32>
    %64 = arith.mulf %62, %63 : vector<32x32xf32>
    %cst_38 = arith.constant dense<0.000000e+00> : vector<32x128xf32>
    %65 = tpu.matmul %64, %4, %cst_38 {dimension_numbers = #tpu.dot_dimension_numbers<[1], [1], [0], [0], [0, 0, 1, 0], [], []>} : vector<32x32xf32>, vector<128x32xf32>, vector<32x128xf32> -> vector<32x128xf32>
    %c0_39 = arith.constant 0 : index
    %c0_40 = arith.constant 0 : index
    %66 = vector.load %arg10[%c0_39, %c0_40] : memref<32x128xf32, #tpu.memory_space<vmem>>, vector<32x128xf32>
    %67 = arith.addf %65, %66 : vector<32x128xf32>
    %cst_41 = arith.constant dense<0xFF800000> : vector<32xf32>
    %68 = vector.multi_reduction <maximumf>, %67, %cst_41 [1] : vector<32x128xf32> to vector<32xf32>
    %69 = vector.shape_cast %68 : vector<32xf32> to vector<32x1xf32>
    %70 = vector.broadcast %69 : vector<32x1xf32> to vector<32x128xf32>
    %71 = arith.subf %67, %70 : vector<32x128xf32>
    %72 = math.exp %71 : vector<32x128xf32>
    %cst_42 = arith.constant dense<0.000000e+00> : vector<32xf32>
    %73 = vector.multi_reduction <add>, %72, %cst_42 [1] : vector<32x128xf32> to vector<32xf32>
    %74 = vector.shape_cast %73 : vector<32xf32> to vector<32x1xf32>
    %75 = vector.broadcast %74 : vector<32x1xf32> to vector<32x128xf32>
    %76 = arith.divf %72, %75 : vector<32x128xf32>
    %cst_43 = arith.constant dense<0.000000e+00> : vector<32x32xf32>
    %77 = tpu.matmul %76, %5, %cst_43 {dimension_numbers = #tpu.dot_dimension_numbers<[1], [0], [0], [1], [0, 0, 1, 1], [], []>} : vector<32x128xf32>, vector<128x32xf32>, vector<32x32xf32> -> vector<32x32xf32>
    %cst_44 = arith.constant dense<0.000000e+00> : vector<128x32xf32>
    %78 = tpu.matmul %3, %64, %cst_44 {dimension_numbers = #tpu.dot_dimension_numbers<[1], [1], [0], [0], [0, 0, 1, 0], [], []>} : vector<128x32xf32>, vector<32x32xf32>, vector<128x32xf32> -> vector<128x32xf32>
    %c0_45 = arith.constant 0 : index
    %c0_46 = arith.constant 0 : index
    %79 = vector.load %arg11[%c0_45, %c0_46] : memref<128x32xf32, #tpu.memory_space<vmem>>, vector<128x32xf32>
    %80 = arith.addf %78, %79 : vector<128x32xf32>
    %cst_47 = arith.constant dense<0xFF800000> : vector<128xf32>
    %81 = vector.multi_reduction <maximumf>, %80, %cst_47 [1] : vector<128x32xf32> to vector<128xf32>
    %82 = vector.shape_cast %81 : vector<128xf32> to vector<128x1xf32>
    %83 = vector.broadcast %82 : vector<128x1xf32> to vector<128x32xf32>
    %84 = arith.subf %80, %83 : vector<128x32xf32>
    %85 = math.exp %84 : vector<128x32xf32>
    %cst_48 = arith.constant dense<0.000000e+00> : vector<128xf32>
    %86 = vector.multi_reduction <add>, %85, %cst_48 [1] : vector<128x32xf32> to vector<128xf32>
    %87 = vector.shape_cast %86 : vector<128xf32> to vector<128x1xf32>
    %88 = vector.broadcast %87 : vector<128x1xf32> to vector<128x32xf32>
    %89 = arith.divf %85, %88 : vector<128x32xf32>
    %cst_49 = arith.constant dense<0.000000e+00> : vector<128x32xf32>
    %90 = tpu.matmul %89, %77, %cst_49 {dimension_numbers = #tpu.dot_dimension_numbers<[1], [0], [0], [1], [0, 0, 1, 1], [], []>} : vector<128x32xf32>, vector<32x32xf32>, vector<128x32xf32> -> vector<128x32xf32>
    %c0_50 = arith.constant 0 : index
    %c0_51 = arith.constant 0 : index
    %91 = vector.load %arg13[%c0_50, %c0_51] : memref<32x32xf32, #tpu.memory_space<vmem>>, vector<32x32xf32>
    %cst_52 = arith.constant dense<0.000000e+00> : vector<128x32xf32>
    %92 = tpu.matmul %90, %91, %cst_52 {dimension_numbers = #tpu.dot_dimension_numbers<[1], [0], [0], [1], [0, 0, 1, 1], [], []>} : vector<128x32xf32>, vector<32x32xf32>, vector<128x32xf32> -> vector<128x32xf32>
    %c0_53 = arith.constant 0 : index
    %c0_54 = arith.constant 0 : index
    %93 = vector.load %arg14[%c0_53, %c0_54] : memref<1x32xf32, #tpu.memory_space<vmem>>, vector<1x32xf32>
    %94 = vector.broadcast %93 : vector<1x32xf32> to vector<128x32xf32>
    %95 = arith.addf %92, %94 : vector<128x32xf32>
    %c0_55 = arith.constant 0 : index
    %c0_56 = arith.constant 0 : index
    %96 = vector.load %arg15[%c0_55, %c0_56] : memref<128x32xf32, #tpu.memory_space<vmem>>, vector<128x32xf32>
    tpu.vector_store %arg15[%c0_55, %c0_56], %95 {strides = array<i32>} : memref<128x32xf32, #tpu.memory_space<vmem>>, vector<128x32xf32>,
    %c0_57 = arith.constant 0 : index
    %c0_58 = arith.constant 0 : index
    %97 = vector.load %arg12[%c0_57, %c0_58] : memref<128x16xf32, #tpu.memory_space<vmem>>, vector<128x16xf32>
    %cst_59 = arith.constant dense<0.000000e+00> : vector<32x16xf32>
    %98 = tpu.matmul %76, %97, %cst_59 {dimension_numbers = #tpu.dot_dimension_numbers<[1], [0], [0], [1], [0, 0, 1, 1], [], []>} : vector<32x128xf32>, vector<128x16xf32>, vector<32x16xf32> -> vector<32x16xf32>
    %c0_60 = arith.constant 0 : index
    %c0_61 = arith.constant 0 : index
    %99 = vector.load %arg16[%c0_60, %c0_61] : memref<32x16xf32, #tpu.memory_space<vmem>>, vector<32x16xf32>
    tpu.vector_store %arg16[%c0_60, %c0_61], %98 {strides = array<i32>} : memref<32x16xf32, #tpu.memory_space<vmem>>, vector<32x16xf32>,
    return
  }
  func.func @transform_0(%arg0: i32) -> (i32, i32) {
    %c0_i32 = arith.constant 0 : i32
    %c0_i32_0 = arith.constant 0 : i32
    return %arg0, %c0_i32 : i32, i32
  }
  func.func @transform_1(%arg0: i32) -> (i32, i32) {
    %c0_i32 = arith.constant 0 : i32
    %c0_i32_0 = arith.constant 0 : i32
    %c0_i32_1 = arith.constant 0 : i32
    return %c0_i32, %c0_i32_0 : i32, i32
  }
  func.func @transform_2(%arg0: i32) -> (i32, i32) {
    %c0_i32 = arith.constant 0 : i32
    %c0_i32_0 = arith.constant 0 : i32
    %c0_i32_1 = arith.constant 0 : i32
    return %c0_i32, %c0_i32_0 : i32, i32
  }
  func.func @transform_3(%arg0: i32) -> (i32, i32) {
    %c0_i32 = arith.constant 0 : i32
    %c0_i32_0 = arith.constant 0 : i32
    %c0_i32_1 = arith.constant 0 : i32
    return %c0_i32, %c0_i32_0 : i32, i32
  }
  func.func @transform_4(%arg0: i32) -> (i32, i32) {
    %c0_i32 = arith.constant 0 : i32
    %c0_i32_0 = arith.constant 0 : i32
    %c0_i32_1 = arith.constant 0 : i32
    return %c0_i32, %c0_i32_0 : i32, i32
  }
  func.func @transform_5(%arg0: i32) -> (i32, i32) {
    %c0_i32 = arith.constant 0 : i32
    %c0_i32_0 = arith.constant 0 : i32
    %c0_i32_1 = arith.constant 0 : i32
    return %c0_i32, %c0_i32_0 : i32, i32
  }
  func.func @transform_6(%arg0: i32) -> (i32, i32) {
    %c0_i32 = arith.constant 0 : i32
    %c0_i32_0 = arith.constant 0 : i32
    %c0_i32_1 = arith.constant 0 : i32
    return %c0_i32, %c0_i32_0 : i32, i32
  }
  func.func @transform_7(%arg0: i32) -> (i32, i32) {
    %c0_i32 = arith.constant 0 : i32
    %c0_i32_0 = arith.constant 0 : i32
    %c0_i32_1 = arith.constant 0 : i32
    return %c0_i32, %c0_i32_0 : i32, i32
  }
  func.func @transform_8(%arg0: i32) -> (i32, i32) {
    %c0_i32 = arith.constant 0 : i32
    %c0_i32_0 = arith.constant 0 : i32
    %c0_i32_1 = arith.constant 0 : i32
    return %c0_i32, %c0_i32_0 : i32, i32
  }
  func.func @transform_9(%arg0: i32) -> (i32, i32) {
    %c0_i32 = arith.constant 0 : i32
    %c0_i32_0 = arith.constant 0 : i32
    %c0_i32_1 = arith.constant 0 : i32
    return %c0_i32, %c0_i32_0 : i32, i32
  }
  func.func @transform_10(%arg0: i32) -> (i32, i32) {
    %c0_i32 = arith.constant 0 : i32
    %c0_i32_0 = arith.constant 0 : i32
    %c0_i32_1 = arith.constant 0 : i32
    return %c0_i32, %c0_i32_0 : i32, i32
  }
  func.func @transform_11(%arg0: i32) -> (i32, i32) {
    %c0_i32 = arith.constant 0 : i32
    %c0_i32_0 = arith.constant 0 : i32
    %c0_i32_1 = arith.constant 0 : i32
    return %c0_i32, %c0_i32_0 : i32, i32
  }
  func.func @transform_12(%arg0: i32) -> (i32, i32) {
    %c0_i32 = arith.constant 0 : i32
    %c0_i32_0 = arith.constant 0 : i32
    %c0_i32_1 = arith.constant 0 : i32
    return %c0_i32, %c0_i32_0 : i32, i32
  }
  func.func @transform_13(%arg0: i32) -> (i32, i32) {
    %c0_i32 = arith.constant 0 : i32
    %c0_i32_0 = arith.constant 0 : i32
    %c0_i32_1 = arith.constant 0 : i32
    return %c0_i32, %c0_i32_0 : i32, i32
  }
  func.func @transform_14(%arg0: i32) -> (i32, i32) {
    %c0_i32 = arith.constant 0 : i32
    %c0_i32_0 = arith.constant 0 : i32
    return %arg0, %c0_i32 : i32, i32
  }
  func.func @transform_15(%arg0: i32) -> (i32, i32) {
    %c0_i32 = arith.constant 0 : i32
    %c0_i32_0 = arith.constant 0 : i32
    return %arg0, %c0_i32 : i32, i32
  }
}

</mosaic_0001>

<bundles_post_ra>
// kernel: tpu_custom_call.1
= control target key start
LH: loop header
LB: loop body
LE: loop exit
PB: predicated region body
PF: predicated region fallthrough
CT: control target
= control target key end

     0   :  { %vm69_vm0 = vcmask 261120   ;;  %s3533_s17 = smov 96   ;;  %v4878_v55 = vmov 0  ;;  %s3535_s28 = smov 64   ;;  %s4818_s1 = inlined_call_operand.vmem [shape: f32[32,96], index: 1, kind: input, shape index: {}]   ;;  %s4819_s0 = inlined_call_operand.vmem [shape: f32[128,32], index: 0, kind: input, shape index: {}]   ;;  %s4820_s2 = inlined_call_operand.vmem [shape: f32[32,16], index: 2, kind: input, shape index: {}]   ;;  %s4821_s3 = inlined_call_operand.vmem [shape: f32[1,16], index: 3, kind: input, shape index: {}]   ;;  %s4822_s4 = inlined_call_operand.vmem [shape: f32[32,128], index: 4, kind: input, shape index: {}]   ;;  %s4823_s5 = inlined_call_operand.vmem [shape: f32[16,128], index: 5, kind: input, shape index: {}]   ;;  %s4824_s8 = inlined_call_operand.vmem [shape: f32[128,32], index: 8, kind: input, shape index: {}]   ;;  %s4825_s6 = inlined_call_operand.vmem [shape: f32[1,128], index: 6, kind: input, shape index: {}]   ;;  %s4826_s7 = inlined_call_operand.vmem [shape: f32[32,128], index: 7, kind: input, shape index: {}]   ;;  %s4827_s9 = inlined_call_operand.vmem [shape: f32[32,128], index: 9, kind: input, shape index: {}]   ;;  %s4828_s10 = inlined_call_operand.vmem [shape: f32[128,32], index: 10, kind: input, shape index: {}]   ;;  %s4829_s12 = inlined_call_operand.vmem [shape: f32[32,32], index: 12, kind: input, shape index: {}]   ;;  %s4830_s11 = inlined_call_operand.vmem [shape: f32[128,16], index: 11, kind: input, shape index: {}]   ;;  %s4831_s13 = inlined_call_operand.vmem [shape: f32[1,32], index: 13, kind: input, shape index: {}]   ;;  %s4832_s14 = inlined_call_operand.vmem [shape: f32[128,32], index: 14, kind: output, shape index: {0}]   ;;  %s4833_s15 = inlined_call_operand.vmem [shape: f32[32,16], index: 15, kind: output, shape index: {1}]  }
   0x1   :  { %v65_v0 = vld [vmem:[%s4818_s1] sm:$0xff]  ;;  %v66_v1 = vld [vmem:[%s4818_s1 + $0x8] sm:$0xff]  ;;  %v67_v2 = vld [vmem:[%s4818_s1 + $0x10] sm:$0xff] }
   0x2   :  { %v3082_v3 = vpack.c.bf16 %v66_v1, %v65_v0  ;;  %v68_v4 = vld [vmem:[%s4818_s1 + $0x18] sm:$0xff]  ;;  %v49_v5 = vld [vmem:[%s4819_s0] sm:$0xff]  ;;  %v264_v8 = vld [vmem:[%s4820_s2 + $0x8] sm:$0xff] }
   0x3   :  { %v3086_v6 = vpack.c.bf16 %v68_v4, %v67_v2  ;;  %2730 = vmatprep.mubr.msk.f32.mxu0 %vm69_vm0, %v49_v5  ;;  %v263_v7 = vld [vmem:[%s4820_s2] sm:$0xff]  ;;  %v265_v9 = vld [vmem:[%s4820_s2 + $0x10] sm:$0xff]  ;;  %v266_v10 = vld [vmem:[%s4820_s2 + $0x18] sm:$0xff] }
   0x4   :  { %3083 = vmatprep.subr.bf16.mxu0 %v3082_v3  ;;  %v50_v11 = vld [vmem:[%s4819_s0 + $0x8] sm:$0xff]  ;;  %v3090_v12 = vpack.c.bf16 %v264_v8, %v263_v7  ;;  %v3094_v13 = vpack.c.bf16 %v266_v10, %v265_v9  ;;  %v51_v14 = vld [vmem:[%s4819_s0 + $0x10] sm:$0xff]  ;;  %v52_v15 = vld [vmem:[%s4819_s0 + $0x18] sm:$0xff] }
   0x5   :  { %3085 = vmatpush3.bf16.msra.mxu0 %v3082_v3  ;;  %v53_v16 = vld [vmem:[%s4819_s0 + $0x20] sm:$0xff]  ;;  %v54_v17 = vld [vmem:[%s4819_s0 + $0x28] sm:$0xff]  ;;  %v55_v18 = vld [vmem:[%s4819_s0 + $0x30] sm:$0xff] }
   0x6   :  { %3087 = vmatprep.subr.bf16.mxu0 %v3086_v6  ;;  %3091 = vmatprep.subr.bf16.mxu1 %v3090_v12  ;;  %v56_v19 = vld [vmem:[%s4819_s0 + $0x38] sm:$0xff]  ;;  %v57_v20 = vld [vmem:[%s4819_s0 + $0x40] sm:$0xff]  ;;  %v58_v21 = vld [vmem:[%s4819_s0 + $0x48] sm:$0xff] }
   0x7   :  { %3093 = vmatpush3.bf16.msra.mxu1 %v3090_v12  ;;  %v59_v22 = vld [vmem:[%s4819_s0 + $0x50] sm:$0xff]  ;;  %v60_v23 = vld [vmem:[%s4819_s0 + $0x58] sm:$0xff]  ;;  %v61_v24 = vld [vmem:[%s4819_s0 + $0x60] sm:$0xff] }
   0x8   :  { %3095 = vmatprep.subr.bf16.mxu1 %v3094_v13  ;;  %v62_v25 = vld [vmem:[%s4819_s0 + $0x68] sm:$0xff]  ;;  %v63_v26 = vld [vmem:[%s4819_s0 + $0x70] sm:$0xff]  ;;  %v64_v27 = vld [vmem:[%s4819_s0 + $0x78] sm:$0xff] }
   0x9   :  { %3089 = vmatpush3.bf16.msra.mxu0 %v3086_v6  ;;  %vm3818_vm1 = vmpackc.low %vm69_vm0, %vm69_vm0 }
   0xa   :  { %v4879_v55 = vsel %vm3818_vm1, 4294967295, %v4878_v55 }
   0xb   :  { %3097 = vmatpush3.bf16.msra.mxu1 %v3094_v13  ;;  %4880 = vst [vmem:[#allocation22_spill] sm:$0xff] %v4879_v55 }
   0xc   :  { %2731 = vmatmul.mubr.msk.f32.vlgmr.msra.gmra.mrb[0].mxu0 %vm69_vm0, %v50_v11 }
   0xd   :  { %2733 = vmatprep.mubr.msk.f32.mxu0 %vm69_vm0, %v51_v14 }
  0x10   :  { %2734 = vmatmul.mubr.msk.f32.gmra.mrb[2].mxu0 %vm69_vm0, %v52_v15 }
  0x11   :  { %2736 = vmatprep.mubr.msk.f32.mxu0 %vm69_vm0, %v53_v16 }
  0x14   :  { %2737 = vmatmul.mubr.msk.f32.gmra.mrb[4].mxu0 %vm69_vm0, %v54_v17 }
  0x15   :  { %2739 = vmatprep.mubr.msk.f32.mxu0 %vm69_vm0, %v55_v18 }
  0x18   :  { %2740 = vmatmul.mubr.msk.f32.gmra.mrb[6].mxu0 %vm69_vm0, %v56_v19 }
  0x19   :  { %2742 = vmatprep.mubr.msk.f32.mxu0 %vm69_vm0, %v57_v20 }
  0x1c   :  { %2743 = vmatmul.mubr.msk.f32.gmra.mrb[8].mxu0 %vm69_vm0, %v58_v21  ;;  %v3857_v21 = vld [vmem:[%s4821_s3] ss:$0 sm:$0xff] }
  0x1d   :  { %2745 = vmatprep.mubr.msk.f32.mxu0 %vm69_vm0, %v59_v22 }
  0x20   :  { %2746 = vmatmul.mubr.msk.f32.gmra.mrb[10].mxu0 %vm69_vm0, %v60_v23 }
  0x21   :  { %2748 = vmatprep.mubr.msk.f32.mxu0 %vm69_vm0, %v61_v24 }
  0x24   :  { %2749 = vmatmul.mubr.msk.f32.gmra.mrb[12].mxu0 %vm69_vm0, %v62_v25 }
  0x25   :  { %2751 = vmatprep.mubr.msk.f32.mxu0 %vm69_vm0, %v63_v26 }
  0x28   :  { %2752 = vmatmul.mubr.msk.f32.gmra.mrb[14].mxu0 %vm69_vm0, %v64_v27 }
  0xdf   :  { %v3704_v28 = vpop.f32.mrb[0].mxu0 }
  0xe0   :  { %4858 = vst [vmem:[#allocation2_spill] sm:$0xff] %v3704_v28  ;;  %v3706_v29 = vpop.f32.mrb[1].mxu0 }
  0xe1   :  { %4859 = vst [vmem:[#allocation3_spill] sm:$0xff] %v3706_v29  ;;  %2762 = vmatprep.mubr.msk.f32.mxu1 %vm69_vm0, %v3706_v29  ;;  %v3712_v30 = vpack.i.bf16 %v3704_v28, %v3706_v29 }
  0xe2   :  { %2763 = vmatmul.mubr.msk.f32.vlgmr.msra.gmra.mrb[0].mxu1 %vm69_vm0, %v3704_v28 }
  0xe3   :  { %3310 = vrot.lane.b32.xlu0 %v3712_v30, %s3533_s17  ;;  %v3718_v31 = vpop.f32.mrb[2].mxu0 }
  0xe4   :  { %4860 = vst [vmem:[#allocation4_spill] sm:$0xff] %v3718_v31  ;;  %v3720_v32 = vpop.f32.mrb[3].mxu0 }
  0xe5   :  { %4861 = vst [vmem:[#allocation5_spill] sm:$0xff] %v3720_v32  ;;  %2765 = vmatprep.mubr.msk.f32.mxu1 %vm69_vm0, %v3720_v32  ;;  %v3726_v33 = vpack.i.bf16 %v3718_v31, %v3720_v32 }
  0xe6   :  { %2766 = vmatmul.mubr.msk.f32.gmra.mrb[2].mxu1 %vm69_vm0, %v3718_v31 }
  0xe7   :  { %3315 = vrot.lane.b32.xlu0 %v3726_v33, %s3533_s17  ;;  %v3732_v34 = vpop.f32.mrb[4].mxu0 }
  0xe8   :  { %4862 = vst [vmem:[#allocation6_spill] sm:$0xff] %v3732_v34  ;;  %v3734_v35 = vpop.f32.mrb[5].mxu0 }
  0xe9   :  { %4863 = vst [vmem:[#allocation7_spill] sm:$0xff] %v3734_v35  ;;  %2768 = vmatprep.mubr.msk.f32.mxu1 %vm69_vm0, %v3734_v35  ;;  %v3740_v36 = vpack.i.bf16 %v3732_v34, %v3734_v35 }
  0xea   :  { %2769 = vmatmul.mubr.msk.f32.gmra.mrb[4].mxu1 %vm69_vm0, %v3732_v34 }
  0xeb   :  { %3320 = vrot.lane.b32.xlu1 %v3740_v36, %s3533_s17  ;;  %v3746_v37 = vpop.f32.mrb[6].mxu0 }
  0xec   :  { %4864 = vst [vmem:[#allocation8_spill] sm:$0xff] %v3746_v37  ;;  %v3748_v38 = vpop.f32.mrb[7].mxu0 }
  0xed   :  { %4865 = vst [vmem:[#allocation9_spill] sm:$0xff] %v3748_v38  ;;  %2771 = vmatprep.mubr.msk.f32.mxu1 %vm69_vm0, %v3748_v38  ;;  %v3754_v39 = vpack.i.bf16 %v3746_v37, %v3748_v38 }
  0xee   :  { %2772 = vmatmul.mubr.msk.f32.gmra.mrb[6].mxu1 %vm69_vm0, %v3746_v37 }
  0xef   :  { %4866 = vst [vmem:[#allocation10_spill] sm:$0xff] %v3754_v39  ;;  %3325 = vrot.lane.b32.xlu1 %v3754_v39, %s3533_s17  ;;  %v3760_v40 = vpop.f32.mrb[8].mxu0 }
  0xf0   :  { %4867 = vst [vmem:[#allocation11_spill] sm:$0xff] %v3760_v40  ;;  %v3762_v41 = vpop.f32.mrb[9].mxu0 }
  0xf1   :  { %4868 = vst [vmem:[#allocation12_spill] sm:$0xff] %v3762_v41  ;;  %2774 = vmatprep.mubr.msk.f32.mxu1 %vm69_vm0, %v3762_v41  ;;  %v3768_v42 = vpack.i.bf16 %v3760_v40, %v3762_v41 }
  0xf2   :  { %2775 = vmatmul.mubr.msk.f32.gmra.mrb[8].mxu1 %vm69_vm0, %v3760_v40 }
  0xf3   :  { %3330 = vrot.lane.b32.xlu0 %v3768_v42, %s3533_s17  ;;  %v3774_v43 = vpop.f32.mrb[10].mxu0 }
  0xf4   :  { %4869 = vst [vmem:[#allocation13_spill] sm:$0xff] %v3774_v43  ;;  %v3776_v44 = vpop.f32.mrb[11].mxu0 }
  0xf5   :  { %4870 = vst [vmem:[#allocation14_spill] sm:$0xff] %v3776_v44  ;;  %2777 = vmatprep.mubr.msk.f32.mxu1 %vm69_vm0, %v3776_v44  ;;  %v3782_v45 = vpack.i.bf16 %v3774_v43, %v3776_v44 }
  0xf6   :  { %2778 = vmatmul.mubr.msk.f32.gmra.mrb[10].mxu1 %vm69_vm0, %v3774_v43 }
  0xf7   :  { %4871 = vst [vmem:[#allocation15_spill] sm:$0xff] %v3782_v45  ;;  %3335 = vrot.lane.b32.xlu1 %v3782_v45, %s3533_s17  ;;  %v3788_v46 = vpop.f32.mrb[12].mxu0 }
  0xf8   :  { %4872 = vst [vmem:[#allocation16_spill] sm:$0xff] %v3788_v46  ;;  %v3790_v47 = vpop.f32.mrb[13].mxu0 }
  0xf9   :  { %4873 = vst [vmem:[#allocation17_spill] sm:$0xff] %v3790_v47  ;;  %2780 = vmatprep.mubr.msk.f32.mxu1 %vm69_vm0, %v3790_v47  ;;  %v3796_v48 = vpack.i.bf16 %v3788_v46, %v3790_v47 }
  0xfa   :  { %2781 = vmatmul.mubr.msk.f32.gmra.mrb[12].mxu1 %vm69_vm0, %v3788_v46 }
  0xfb   :  { %4874 = vst [vmem:[#allocation18_spill] sm:$0xff] %v3796_v48  ;;  %3340 = vrot.lane.b32.xlu0 %v3796_v48, %s3533_s17  ;;  %v3802_v49 = vpop.f32.mrb[14].mxu0 }
  0xfc   :  { %4875 = vst [vmem:[#allocation19_spill] sm:$0xff] %v3802_v49  ;;  %v3804_v50 = vpop.f32.mrb[15].mxu0 }
  0xfd   :  { %4876 = vst [vmem:[#allocation20_spill] sm:$0xff] %v3804_v50  ;;  %2783 = vmatprep.mubr.msk.f32.mxu1 %vm69_vm0, %v3804_v50  ;;  %v3810_v51 = vpack.i.bf16 %v3802_v49, %v3804_v50  ;;  %v4881_v50 = vmov -1.0  }
  0xfe   :  { %2784 = vmatmul.mubr.msk.f32.gmra.mrb[14].mxu1 %vm69_vm0, %v3802_v49 }
  0xff   :  { %4877 = vst [vmem:[#allocation21_spill] sm:$0xff] %v3810_v51  ;;  %3345 = vrot.lane.b32.xlu1 %v3810_v51, %s3533_s17 }
 0x155   :  { %v3311_v52 = vpop.permute.xlu0 %3310 }
 0x156   :  { %v3313_v53 = vunpack.i.h.bf16 %v3311_v52  ;;  %v3312_v54 = vunpack.i.l.bf16 %v3311_v52 }
 0x158   :  { %v3166_v56 = vpack.c.bf16 %v3313_v53, %v3312_v54 }
 0x159   :  { %v3316_v57 = vpop.permute.xlu0 %3315 }
 0x15a   :  { %v3318_v58 = vunpack.i.h.bf16 %v3316_v57  ;;  %v3317_v59 = vunpack.i.l.bf16 %v3316_v57  ;;  %3168 = vmatprep.subr.msk.bf16.mxu1 %vm3818_vm1, %v3166_v56 }
 0x15b   :  { %3171 = vmatpush3.bf16.xpose.msk.msra.mxu1 %vm3818_vm1, %v3166_v56 }
 0x15c   :  { %v3172_v60 = vpack.c.bf16 %v3318_v58, %v3317_v59 }
 0x15d   :  { %v3321_v61 = vpop.permute.xlu1 %3320 }
 0x15e   :  { %v3323_v62 = vunpack.i.h.bf16 %v3321_v61  ;;  %v3322_v63 = vunpack.i.l.bf16 %v3321_v61  ;;  %3174 = vmatprep.subr.msk.bf16.mxu1 %vm3818_vm1, %v3172_v60 }
 0x160   :  { %v3178_v0 = vpack.c.bf16 %v3323_v62, %v3322_v63 }
 0x161   :  { %v3326_v1 = vpop.permute.xlu1 %3325 }
 0x162   :  { %v3328_v2 = vunpack.i.h.bf16 %v3326_v1  ;;  %v3327_v3 = vunpack.i.l.bf16 %v3326_v1  ;;  %v899_v1 = vld [vmem:[%s4822_s4] sm:$0xff] }
 0x163   :  { %3177 = vmatpush3.bf16.xpose.msk.msra.mxu1 %vm3818_vm1, %v3172_v60  ;;  %2818 = vmatprep.mubr.f32.mxu0 %v899_v1 }
 0x164   :  { %3180 = vmatprep.subr.msk.bf16.mxu1 %vm3818_vm1, %v3178_v0  ;;  %v3184_v4 = vpack.c.bf16 %v3328_v2, %v3327_v3 }
 0x165   :  { %v3331_v5 = vpop.permute.xlu0 %3330 }
 0x166   :  { %v3333_v6 = vunpack.i.h.bf16 %v3331_v5  ;;  %v3332_v7 = vunpack.i.l.bf16 %v3331_v5 }
 0x168   :  { %v3190_v8 = vpack.c.bf16 %v3333_v6, %v3332_v7 }
 0x169   :  { %v3336_v9 = vpop.permute.xlu1 %3335 }
 0x16a   :  { %v3338_v10 = vunpack.i.h.bf16 %v3336_v9  ;;  %v3337_v11 = vunpack.i.l.bf16 %v3336_v9 }
 0x16b   :  { %3183 = vmatpush3.bf16.xpose.msk.msra.mxu1 %vm3818_vm1, %v3178_v0 }
 0x16c   :  { %3186 = vmatprep.subr.msk.bf16.mxu1 %vm3818_vm1, %v3184_v4  ;;  %v3196_v12 = vpack.c.bf16 %v3338_v10, %v3337_v11 }
 0x16d   :  { %v3341_v13 = vpop.permute.xlu0 %3340 }
 0x16e   :  { %v3343_v14 = vunpack.i.h.bf16 %v3341_v13  ;;  %v3342_v15 = vunpack.i.l.bf16 %v3341_v13 }
 0x170   :  { %v3202_v16 = vpack.c.bf16 %v3343_v14, %v3342_v15 }
 0x171   :  { %v3346_v17 = vpop.permute.xlu1 %3345 }
 0x172   :  { %v3348_v18 = vunpack.i.h.bf16 %v3346_v17  ;;  %v3347_v19 = vunpack.i.l.bf16 %v3346_v17 }
 0x173   :  { %3189 = vmatpush3.bf16.xpose.msk.msra.mxu1 %vm3818_vm1, %v3184_v4 }
 0x174   :  { %3192 = vmatprep.subr.msk.bf16.mxu1 %vm3818_vm1, %v3190_v8  ;;  %v3208_v20 = vpack.c.bf16 %v3348_v18, %v3347_v19 }
 0x17b   :  { %3195 = vmatpush3.bf16.xpose.msk.msra.mxu1 %vm3818_vm1, %v3190_v8 }
 0x17c   :  { %3198 = vmatprep.subr.msk.bf16.mxu1 %vm3818_vm1, %v3196_v12 }
 0x183   :  { %3201 = vmatpush3.bf16.xpose.msk.msra.mxu1 %vm3818_vm1, %v3196_v12 }
 0x184   :  { %3204 = vmatprep.subr.msk.bf16.mxu1 %vm3818_vm1, %v3202_v16 }
 0x18b   :  { %3207 = vmatpush3.bf16.xpose.msk.msra.mxu1 %vm3818_vm1, %v3202_v16 }
 0x18c   :  { %3210 = vmatprep.subr.msk.bf16.mxu1 %vm3818_vm1, %v3208_v20 }
 0x193   :  { %3213 = vmatpush3.bf16.xpose.msk.msra.mxu1 %vm3818_vm1, %v3208_v20 }
 0x1b5   :  { %v2764_v22 = vpop.f32.mrb[0].mxu1 }
 0x1b6   :  { %v394_v23 = vadd.f32 %v2764_v22, %v3857_v21  ;;  %v388_v24 = vpop.f32.mrb[1].mxu1 }
 0x1b7   :  { %v389_v25 = vadd.f32 %v3857_v21, %v388_v24 }
 0x1b8   :  { %v484_v26 = vmul.f32 0.70710677, %v394_v23  ;;  %v3897_v22 = vmul.f32 0.5, %v394_v23 }
 0x1b9   :  { %v483_v27 = vmul.f32 0.70710677, %v389_v25  ;;  %v2767_v52 = vpop.f32.mrb[2].mxu1 }
 0x1ba   :  { %v532_v53 = vand.u32 2147483647, %v484_v26  ;;  %v404_v54 = vadd.f32 %v2767_v52, %v3857_v21  ;;  %v398_v56 = vpop.f32.mrb[3].mxu1  ;;  %vm500_vm2 = vcmp.ge.f32.partialorder %v484_v26, 0.0 }
 0x1bb   :  { %v531_v57 = vand.u32 2147483647, %v483_v27  ;;  %v399_v58 = vadd.f32 %v3857_v21, %v398_v56  ;;  %vm499_vm3 = vcmp.ge.f32.partialorder %v483_v27, 0.0  ;;  %v3902_v56 = vmul.f32 0.5, %v389_v25 }
 0x1bc   :  { %v548_v59 = vmul.f32 0.3275911, %v532_v53  ;;  %v3863_v61 = vmul.f32 0.70710677, %v404_v54  ;;  %v756_v12 = vsub.f32 0.0, %v532_v53 }
 0x1bd   :  { %v547_v60 = vmul.f32 0.3275911, %v531_v57  ;;  %v3865_v63 = vmul.f32 0.70710677, %v399_v58  ;;  %v2770_v0 = vpop.f32.mrb[4].mxu1  ;;  %v755_v15 = vsub.f32 0.0, %v531_v57 }
 0x1be   :  { %v564_v62 = vadd.f32 1.0, %v548_v59  ;;  %v3871_v3 = vand.u32 2147483647, %v3863_v61  ;;  %v408_v4 = vpop.f32.mrb[5].mxu1  ;;  %v3878_v8 = vadd.f32 %v2770_v0, %v3857_v21  ;;  %v772_v52 = vmul.f32 %v756_v12, %v532_v53 }
 0x1bf   :  { %v563_v2 = vadd.f32 1.0, %v547_v60  ;;  %v3875_v7 = vand.u32 2147483647, %v3865_v63  ;;  %v3881_v11 = vadd.f32 %v3857_v21, %v408_v4  ;;  %v4834_v60 = vmov -1.0  }
 0x1c0   :  { %3389 = vrcp.f32 %v564_v62  ;;  %v550_v5 = vmul.f32 0.3275911, %v3871_v3  ;;  %v3885_v14 = vmul.f32 0.70710677, %v3878_v8  ;;  %v3906_v26 = vsel %vm500_vm2, 1.0, %v4834_v60 }
 0x1c1   :  { %3391 = vrcp.f32 %v563_v2  ;;  %v2773_v6 = vpop.f32.mrb[6].mxu1  ;;  %v549_v13 = vmul.f32 0.3275911, %v3875_v7  ;;  %v3888_v16 = vmul.f32 0.70710677, %v3881_v11  ;;  %v771_v62 = vmul.f32 %v755_v15, %v531_v57 }
 0x1c2   :  { %v418_v9 = vpop.f32.mrb[7].mxu1  ;;  %v566_v10 = vadd.f32 1.0, %v550_v5  ;;  %v3893_v19 = vand.u32 2147483647, %v3885_v14  ;;  %v3910_v23 = vadd.f32 %v2773_v6, %v3857_v21  ;;  %v3917_v25 = vsel %vm499_vm3, 1.0, %v4834_v60 }
 0x1c3   :  { %v565_v18 = vadd.f32 1.0, %v549_v13  ;;  %v3900_v24 = vand.u32 2147483647, %v3888_v16  ;;  %v3919_v53 = vmul.f32 0.5, %v404_v54  ;;  %v3921_v2 = vmul.f32 0.5, %v399_v58 }
 0x1c4   :  { %3393 = vrcp.f32 %v566_v10  ;;  %v552_v59 = vmul.f32 0.3275911, %v3893_v19  ;;  %vm502_vm4 = vcmp.ge.f32.partialorder %v3863_v61, 0.0  ;;  %v3930_v12 = vadd.f32 %v3857_v21, %v418_v9 }
 0x1c5   :  { %v3890_v17 = vpop.f32.mrb[8].mxu1  ;;  %3395 = vrcp.f32 %v565_v18  ;;  %v551_v0 = vmul.f32 0.3275911, %v3900_v24  ;;  %v789_v13 = vmul.f32 1.442695, %v772_v52  ;;  %vm501_vm5 = vcmp.ge.f32.partialorder %v3865_v63, 0.0 }
 0x1c6   :  { %v3895_v20 = vpop.f32.mrb[9].mxu1  ;;  %v568_v4 = vadd.f32 1.0, %v552_v59  ;;  %v3934_v54 = vmul.f32 0.70710677, %v3910_v23  ;;  %v787_v18 = vmul.f32 1.442695, %v771_v62 }
 0x1c7   :  { %v567_v6 = vadd.f32 1.0, %v551_v0  ;;  %v758_v0 = vsub.f32 0.0, %v3871_v3  ;;  %v3951_v62 = vsel %vm502_vm4, 1.0, %v4881_v50  ;;  %v3963_v61 = vsel %vm501_vm5, 1.0, %v4881_v50 }
 0x1c8   :  { %3397 = vrcp.f32 %v568_v4  ;;  %v3941_v9 = vand.u32 2147483647, %v3934_v54  ;;  %v3981_v31 = vmul.f32 0.5, %v3878_v8  ;;  %vm504_vm6 = vcmp.ge.f32.partialorder %v3885_v14, 0.0 }
 0x1c9   :  { %v3912_v27 = vpop.f32.mrb[10].mxu1  ;;  %3399 = vrcp.f32 %v567_v6  ;;  %v3955_v6 = vmul.f32 0.70710677, %v3930_v12  ;;  %v774_v41 = vmul.f32 %v758_v0, %v3871_v3  ;;  %vm503_vm7 = vcmp.ge.f32.partialorder %v3888_v16, 0.0 }
 0x1ca   :  { %v3914_v1 = vpop.eup %3389  ;;  %v3923_v5 = vpop.f32.mrb[11].mxu1  ;;  %3401 = vpow2.f32 %v789_v13  ;;  %v554_v47 = vmul.f32 0.3275911, %v3941_v9  ;;  %v4020_v16 = vmul.f32 0.5, %v3910_v23  ;;  %vm506_vm8 = vcmp.ge.f32.partialorder %v3934_v54, 0.0 }
 0x1cb   :  { %v3925_v57 = vpop.eup %3391  ;;  %v612_v10 = vmul.f32 1.0614054, %v3914_v1  ;;  %3403 = vpow2.f32 %v787_v18  ;;  %v793_v28 = vmul.f32 1.442695, %v774_v41  ;;  %vm505_vm9 = vcmp.ge.f32.partialorder %v3955_v6, 0.0 }
 0x1cc   :  { %v611_v15 = vmul.f32 1.0614054, %v3925_v57  ;;  %v570_v37 = vadd.f32 1.0, %v554_v47  ;;  %vm997_vm4 = vcmask 130048  }
 0x1cd   :  { %v628_v58 = vadd.f32 -1.4531521, %v612_v10  ;;  %v3937_v59 = vpop.f32.mrb[12].mxu1  ;;  %v757_v10 = vsub.f32 0.0, %v3875_v7 }
 0x1ce   :  { %v627_v60 = vadd.f32 -1.4531521, %v611_v15  ;;  %v3943_v52 = vpop.f32.mrb[13].mxu1  ;;  %v3945_v49 = vpop.eup %3393  ;;  %3405 = vrcp.f32 %v570_v37 }
 0x1cf   :  { %v644_v4 = vmul.f32 %v3914_v1, %v628_v58  ;;  %v614_v46 = vmul.f32 1.0614054, %v3945_v49  ;;  %v3966_v58 = vand.u32 2147483647, %v3955_v6  ;;  %v3970_v40 = vpop.eup %3395 }
 0x1d0   :  { %v643_v15 = vmul.f32 %v3925_v57, %v627_v60  ;;  %v613_v63 = vmul.f32 1.0614054, %v3970_v40 }
 0x1d1   :  { %v660_v43 = vadd.f32 1.4214138, %v644_v4  ;;  %v3968_v44 = vpop.f32.mrb[14].mxu1  ;;  %v630_v60 = vadd.f32 -1.4531521, %v614_v46  ;;  %v773_v4 = vmul.f32 %v757_v10, %v3875_v7  ;;  %v760_v46 = vsub.f32 0.0, %v3893_v19 }
 0x1d2   :  { %v659_v13 = vadd.f32 1.4214138, %v643_v15  ;;  %v3973_v38 = vpop.f32.mrb[15].mxu1  ;;  %v553_v34 = vmul.f32 0.3275911, %v3966_v58 }
 0x1d3   :  { %v676_v18 = vmul.f32 %v3914_v1, %v660_v43  ;;  %v646_v35 = vmul.f32 %v3945_v49, %v630_v60  ;;  %v629_v0 = vadd.f32 -1.4531521, %v613_v63  ;;  %v3985_v43 = vpop.eup %3397  ;;  %v791_v10 = vmul.f32 1.442695, %v773_v4 }
 0x1d4   :  { %v675_v47 = vmul.f32 %v3925_v57, %v659_v13  ;;  %v569_v15 = vadd.f32 1.0, %v553_v34  ;;  %v3989_v7 = vpop.eup %3399  ;;  %v616_v37 = vmul.f32 1.0614054, %v3985_v43  ;;  %v776_v34 = vmul.f32 %v760_v46, %v3893_v19 }
 0x1d5   :  { %v692_v3 = vadd.f32 -0.28449672, %v676_v18  ;;  %v662_v32 = vadd.f32 1.4214138, %v646_v35  ;;  %v645_v8 = vmul.f32 %v3970_v40, %v629_v0  ;;  %v615_v60 = vmul.f32 1.0614054, %v3989_v7  ;;  %v3402_v55 = vpop.eup %3401 }
 0x1d6   :  { %3407 = vrcp.f32 %v569_v15  ;;  %v759_v35 = vsub.f32 0.0, %v3900_v24  ;;  %v691_v18 = vadd.f32 -0.28449672, %v675_v47  ;;  %v632_v29 = vadd.f32 -1.4531521, %v616_v37  ;;  %v3404_v15 = vpop.eup %3403 }
 0x1d7   :  { %v678_v13 = vmul.f32 %v3945_v49, %v662_v32  ;;  %v708_v41 = vmul.f32 %v3914_v1, %v692_v3  ;;  %v661_v63 = vadd.f32 1.4214138, %v645_v8  ;;  %3409 = vpow2.f32 %v793_v28 }
 0x1d8   :  { %v3999_v4 = vmul.f32 0.5, %v3881_v11  ;;  %v631_v0 = vadd.f32 -1.4531521, %v615_v60  ;;  %v4005_v19 = vsel %vm504_vm6, 1.0, %v4881_v50  ;;  %v648_v46 = vmul.f32 %v3985_v43, %v632_v29  ;;  %v4016_v60 = vpop.eup %3405 }
 0x1d9   :  { %v694_v51 = vadd.f32 -0.28449672, %v678_v13  ;;  %v677_v32 = vmul.f32 %v3970_v40, %v661_v63  ;;  %v4011_v3 = vsel %vm503_vm7, 1.0, %v4881_v50  ;;  %3411 = vpow2.f32 %v791_v10 }
 0x1da   :  { %v797_v28 = vmul.f32 1.442695, %v776_v34  ;;  %v647_v11 = vmul.f32 %v3989_v7, %v631_v0  ;;  %v775_v47 = vmul.f32 %v759_v35, %v3900_v24  ;;  %v724_v8 = vadd.f32 0.2548296, %v708_v41 }
 0x1db   :  { %v707_v37 = vmul.f32 %v3925_v57, %v691_v18  ;;  %v693_v13 = vadd.f32 -0.28449672, %v677_v32  ;;  %v664_v14 = vadd.f32 1.4214138, %v648_v46  ;;  %v710_v29 = vmul.f32 %v3945_v49, %v694_v51 }
 0x1dc   :  { %v663_v63 = vadd.f32 1.4214138, %v647_v11  ;;  %v762_v10 = vsub.f32 0.0, %v3941_v9  ;;  %v618_v24 = vmul.f32 1.0614054, %v4016_v60  ;;  %v4028_v35 = vadd.f32 %v3890_v17, %v3857_v21 }
 0x1dd   :  { %v709_v34 = vmul.f32 %v3970_v40, %v693_v13  ;;  %v680_v0 = vmul.f32 %v3985_v43, %v664_v14  ;;  %3413 = vpow2.f32 %v797_v28  ;;  %v795_v51 = vmul.f32 1.442695, %v775_v47 }
 0x1de   :  { %v679_v41 = vmul.f32 %v3989_v7, %v663_v63  ;;  %v4032_v18 = vmul.f32 0.5, %v3930_v12  ;;  %v740_v32 = vmul.f32 %v3914_v1, %v724_v8  ;;  %v723_v46 = vadd.f32 0.2548296, %v707_v37 }
 0x1df   :  { %v696_v11 = vadd.f32 -0.28449672, %v680_v0  ;;  %v634_v13 = vadd.f32 -1.4531521, %v618_v24  ;;  %v726_v14 = vadd.f32 0.2548296, %v710_v29  ;;  %v778_v45 = vmul.f32 %v762_v10, %v3941_v9 }
 0x1e0   :  { %v4034_v23 = vpop.eup %3407  ;;  %v695_v48 = vadd.f32 -0.28449672, %v679_v41  ;;  %v725_v28 = vadd.f32 0.2548296, %v709_v34  ;;  %v4042_v12 = vmul.f32 0.70710677, %v4028_v35  ;;  %3415 = vpow2.f32 %v795_v51 }
 0x1e1   :  { %v617_v17 = vmul.f32 1.0614054, %v4034_v23  ;;  %v712_v63 = vmul.f32 %v3985_v43, %v696_v11  ;;  %v650_v47 = vmul.f32 %v4016_v60, %v634_v13  ;;  %v3410_v39 = vpop.eup %3409  ;;  %v761_v37 = vsub.f32 0.0, %v3966_v58 }
 0x1e2   :  { %v711_v1 = vmul.f32 %v3989_v7, %v695_v48  ;;  %v820_v29 = vmul.f32 %v3402_v55, %v740_v32  ;;  %v739_v9 = vmul.f32 %v3925_v57, %v723_v46  ;;  %v742_v0 = vmul.f32 %v3945_v49, %v726_v14 }
 0x1e3   :  { %v633_v8 = vadd.f32 -1.4531521, %v617_v17  ;;  %v666_v10 = vadd.f32 1.4214138, %v650_v47  ;;  %v3412_v34 = vpop.eup %3411  ;;  %v728_v24 = vadd.f32 0.2548296, %v712_v63  ;;  %v741_v13 = vmul.f32 %v3970_v40, %v725_v28 }
 0x1e4   :  { %v801_v41 = vmul.f32 1.442695, %v778_v45  ;;  %v727_v48 = vadd.f32 0.2548296, %v711_v1  ;;  %v540_v17 = vand.u32 2147483647, %v4042_v12  ;;  %v777_v57 = vmul.f32 %v761_v37, %v3966_v58 }
 0x1e5   :  { %v649_v11 = vmul.f32 %v4034_v23, %v633_v8  ;;  %v682_v51 = vmul.f32 %v4016_v60, %v666_v10  ;;  %v4057_v32 = vadd.f32 %v3857_v21, %v3895_v20  ;;  %v836_v49 = vsub.f32 1.0, %v820_v29 }
 0x1e6   :  { %v819_v45 = vmul.f32 %v3404_v15, %v739_v9  ;;  %v556_v14 = vmul.f32 0.3275911, %v540_v17  ;;  %v822_v40 = vmul.f32 %v3410_v39, %v742_v0  ;;  %v744_v28 = vmul.f32 %v3985_v43, %v728_v24 }
 0x1e7   :  { %v665_v55 = vadd.f32 1.4214138, %v649_v11  ;;  %v698_v46 = vadd.f32 -0.28449672, %v682_v51  ;;  %v3414_v63 = vpop.eup %3413  ;;  %3417 = vpow2.f32 %v801_v41  ;;  %v821_v1 = vmul.f32 %v3412_v34, %v741_v13 }
 0x1e8   :  { %v743_v8 = vmul.f32 %v3989_v7, %v727_v48  ;;  %v572_v37 = vadd.f32 1.0, %v556_v14  ;;  %v799_v20 = vmul.f32 1.442695, %v777_v57  ;;  %v4064_v29 = vmul.f32 0.70710677, %v4057_v32 }
 0x1e9   :  { %v681_v47 = vmul.f32 %v4034_v23, %v665_v55  ;;  %v714_v58 = vmul.f32 %v4016_v60, %v698_v46  ;;  %v852_v15 = vmul.f32 %v836_v49, %v3906_v26  ;;  %v835_v9 = vsub.f32 1.0, %v819_v45 }
 0x1ea   :  { %3419 = vrcp.f32 %v572_v37  ;;  %v3416_v43 = vpop.eup %3415  ;;  %v824_v0 = vmul.f32 %v3414_v63, %v744_v28  ;;  %v522_v34 = vsel %vm506_vm8, 1.0, %v4881_v50  ;;  %v4073_v7 = vsel %vm505_vm9, 1.0, %v4881_v50 }
 0x1eb   :  { %v697_v10 = vadd.f32 -0.28449672, %v681_v47  ;;  %v730_v39 = vadd.f32 0.2548296, %v714_v58  ;;  %v4077_v24 = vadd.f32 %v3912_v27, %v3857_v21  ;;  %v838_v41 = vsub.f32 1.0, %v822_v40 }
 0x1ec   :  { %v837_v26 = vsub.f32 1.0, %v821_v1  ;;  %v823_v11 = vmul.f32 %v3416_v43, %v743_v8  ;;  %v539_v13 = vand.u32 2147483647, %v4064_v29  ;;  %3421 = vpow2.f32 %v799_v20 }
 0x1ed   :  { %v713_v48 = vmul.f32 %v4034_v23, %v697_v10  ;;  %v4082_v54 = vmul.f32 0.5, %v4028_v35  ;;  %vm508_vm10 = vcmp.ge.f32.partialorder %v4042_v12, 0.0  ;;  %v868_v6 = vadd.f32 1.0, %v852_v15 }
 0x1ee   :  { %v851_v51 = vmul.f32 %v835_v9, %v3917_v25  ;;  %v746_v55 = vmul.f32 %v4016_v60, %v730_v39  ;;  %v555_v27 = vmul.f32 0.3275911, %v539_v13  ;;  %v840_v57 = vsub.f32 1.0, %v824_v0 }
 0x1ef   :  { %v764_v49 = vsub.f32 0.0, %v540_v17  ;;  %v4088_v45 = vmul.f32 0.70710677, %v4077_v24  ;;  %v4092_v46 = vadd.f32 %v3857_v21, %v3923_v5  ;;  %v854_v35 = vmul.f32 %v838_v41, %v3951_v62 }
 0x1f0   :  { %v853_v14 = vmul.f32 %v837_v26, %v3963_v61  ;;  %v839_v12 = vsub.f32 1.0, %v823_v11  ;;  %v571_v63 = vadd.f32 1.0, %v555_v27  ;;  %v729_v25 = vadd.f32 0.2548296, %v713_v48 }
 0x1f1   :  { %v3418_v40 = vpop.eup %3417  ;;  %v4097_v60 = vsel %vm508_vm10, 1.0, %v4881_v50  ;;  %v542_v28 = vand.u32 2147483647, %v4088_v45  ;;  %v4102_v47 = vadd.f32 %v3937_v59, %v3857_v21  ;;  %v4105_v5 = vmul.f32 %v868_v6, %v3897_v22 }
 0x1f2   :  { %v867_v1 = vadd.f32 1.0, %v851_v51  ;;  %v826_v62 = vmul.f32 %v3418_v40, %v746_v55  ;;  %3423 = vrcp.f32 %v571_v63  ;;  %v856_v61 = vmul.f32 %v840_v57, %v4005_v19 }
 0x1f3   :  { %v780_v8 = vmul.f32 %v764_v49, %v540_v17  ;;  %v558_v58 = vmul.f32 0.3275911, %v542_v28  ;;  %v4109_v37 = vmul.f32 0.70710677, %v4092_v46  ;;  %v870_v20 = vadd.f32 1.0, %v854_v35 }
 0x1f4   :  { %v4111_v10 = vpop.eup %3419  ;;  %v869_v15 = vadd.f32 1.0, %v853_v14  ;;  %v855_v59 = vmul.f32 %v839_v12, %v4011_v3  ;;  %v763_v9 = vsub.f32 0.0, %v539_v13  ;;  %v745_v22 = vmul.f32 %v4034_v23, %v729_v25 }
 0x1f5   :  { %v620_v39 = vmul.f32 1.0614054, %v4111_v10  ;;  %v574_v43 = vadd.f32 1.0, %v558_v58  ;;  %v4117_v0 = vmul.f32 0.70710677, %v4102_v47  ;;  %v883_v19 = vmul.f32 %v867_v1, %v3902_v56 }
 0x1f6   :  { %v842_v17 = vsub.f32 1.0, %v826_v62  ;;  %v4121_v41 = vmul.f32 0.5, %v4057_v32  ;;  %v541_v26 = vand.u32 2147483647, %v4109_v37  ;;  %v3422_v11 = vpop.eup %3421  ;;  %v872_v48 = vadd.f32 1.0, %v856_v61 }
 0x1f7   :  { %v636_v3 = vadd.f32 -1.4531521, %v620_v39  ;;  %v805_v6 = vmul.f32 1.442695, %v780_v8  ;;  %3425 = vrcp.f32 %v574_v43  ;;  %v886_v23 = vmul.f32 %v870_v20, %v3919_v53 }
 0x1f8   :  { %v885_v51 = vmul.f32 %v869_v15, %v3921_v2  ;;  %v779_v55 = vmul.f32 %v763_v9, %v539_v13  ;;  %v557_v27 = vmul.f32 0.3275911, %v541_v26  ;;  %v871_v57 = vadd.f32 1.0, %v855_v59 }
 0x1f9   :  { %v825_v49 = vmul.f32 %v3422_v11, %v745_v22  ;;  %v652_v56 = vmul.f32 %v4111_v10, %v636_v3  ;;  %v544_v32 = vand.u32 2147483647, %v4117_v0  ;;  %v858_v35 = vmul.f32 %v842_v17, %v522_v34 }
 0x1fa   :  { %v766_v14 = vsub.f32 0.0, %v542_v28  ;;  %v573_v12 = vadd.f32 1.0, %v557_v27  ;;  %v4130_v63 = vadd.f32 %v3857_v21, %v3943_v52  ;;  %v4133_v40 = vmul.f32 %v872_v48, %v3981_v31 }
 0x1fb   :  { %v668_v53 = vadd.f32 1.4214138, %v652_v56  ;;  %3427 = vpow2.f32 %v805_v6  ;;  %v560_v2 = vmul.f32 0.3275911, %v544_v32  ;;  %v803_v25 = vmul.f32 1.442695, %v779_v55 }
 0x1fc   :  { %v4135_v13 = vpop.eup %3423  ;;  %3429 = vrcp.f32 %v573_v12  ;;  %v4138_v1 = vmul.f32 0.70710677, %v4130_v63  ;;  %v4142_v34 = vadd.f32 %v3968_v44, %v3857_v21  ;;  %v841_v62 = vsub.f32 1.0, %v825_v49 }
 0x1fd   :  { %v684_v52 = vmul.f32 %v4111_v10, %v668_v53  ;;  %v619_v31 = vmul.f32 1.0614054, %v4135_v13  ;;  %v576_v61 = vadd.f32 1.0, %v560_v2  ;;  %v4147_v8 = vmul.f32 %v871_v57, %v3999_v4 }
 0x1fe   :  { %v874_v58 = vadd.f32 1.0, %v858_v35  ;;  %v782_v20 = vmul.f32 %v766_v14, %v542_v28  ;;  %v543_v15 = vand.u32 2147483647, %v4138_v1  ;;  %v765_v22 = vsub.f32 0.0, %v541_v26 }
 0x1ff   :  { %v700_v59 = vadd.f32 -0.28449672, %v684_v52  ;;  %v635_v9 = vadd.f32 -1.4531521, %v619_v31  ;;  %3431 = vrcp.f32 %v576_v61  ;;  %v768_v44 = vsub.f32 0.0, %v544_v32 }
 0x200   :  { %3433 = vpow2.f32 %v803_v25  ;;  %v559_v39 = vmul.f32 0.3275911, %v543_v15  ;;  %v4151_v43 = vmul.f32 0.70710677, %v4142_v34  ;;  %v857_v11 = vmul.f32 %v841_v62, %v4073_v7 }
 0x201   :  { %v4153_v17 = vpop.eup %3425  ;;  %v716_v4 = vmul.f32 %v4111_v10, %v700_v59  ;;  %v651_v28 = vmul.f32 %v4135_v13, %v635_v9  ;;  %v4160_v48 = vadd.f32 %v3857_v21, %v3973_v38  ;;  %v4163_v3 = vmul.f32 %v874_v58, %v4020_v16 }
 0x202   :  { %v622_v6 = vmul.f32 1.0614054, %v4153_v17  ;;  %v809_v55 = vmul.f32 1.442695, %v782_v20  ;;  %v575_v27 = vadd.f32 1.0, %v559_v39  ;;  %v781_v56 = vmul.f32 %v765_v22, %v541_v26 }
 0x203   :  { %v732_v57 = vadd.f32 0.2548296, %v716_v4  ;;  %v667_v49 = vadd.f32 1.4214138, %v651_v28  ;;  %v3098_v7 = vpack.c.bf16 %v4105_v5, %v883_v19  ;;  %v784_v14 = vmul.f32 %v768_v44, %v544_v32 }
 0x204   :  { %v638_v35 = vadd.f32 -1.4531521, %v622_v6  ;;  %3435 = vrcp.f32 %v575_v27  ;;  %v4168_v12 = vand.u32 2147483647, %v4151_v43  ;;  %v4173_v53 = vmul.f32 0.70710677, %v4160_v48 }
 0x205   :  { %v3428_v38 = vpop.eup %3427  ;;  %v748_v21 = vmul.f32 %v4111_v10, %v732_v57  ;;  %v683_v16 = vmul.f32 %v4135_v13, %v667_v49  ;;  %3099 = vmatprep.subr.bf16.mxu0 %v3098_v7  ;;  %v3102_v2 = vpack.c.bf16 %v886_v23, %v885_v51  ;;  %v873_v26 = vadd.f32 1.0, %v857_v11 }
 0x206   :  { %v4175_v25 = vpop.eup %3429  ;;  %v654_v5 = vmul.f32 %v4153_v17, %v638_v35  ;;  %v767_v19 = vsub.f32 0.0, %v543_v15  ;;  %v562_v32 = vmul.f32 0.3275911, %v4168_v12  ;;  %3101 = vmatpush3.bf16.msra.mxu0 %v3098_v7  ;;  %vm507_vm11 = vcmp.ge.f32.partialorder %v4064_v29, 0.0 }
 0x207   :  { %v828_v62 = vmul.f32 %v3428_v38, %v748_v21  ;;  %v699_v10 = vadd.f32 -0.28449672, %v683_v16  ;;  %v621_v52 = vmul.f32 1.0614054, %v4175_v25  ;;  %v807_v31 = vmul.f32 1.442695, %v781_v56  ;;  %3103 = vmatprep.subr.bf16.mxu0 %v3102_v2 }
 0x208   :  { %v670_v61 = vadd.f32 1.4214138, %v654_v5  ;;  %3437 = vpow2.f32 %v809_v55  ;;  %v813_v23 = vmul.f32 1.442695, %v784_v14  ;;  %v578_v51 = vadd.f32 1.0, %v562_v32 }
 0x209   :  { %v4181_v58 = vpop.eup %3431  ;;  %v844_v20 = vsub.f32 1.0, %v828_v62  ;;  %v715_v59 = vmul.f32 %v4135_v13, %v699_v10  ;;  %v637_v9 = vadd.f32 -1.4531521, %v621_v52  ;;  %v4185_v22 = vand.u32 2147483647, %v4173_v53 }
 0x20a   :  { %v3434_v44 = vpop.eup %3433  ;;  %v686_v39 = vmul.f32 %v4153_v17, %v670_v61  ;;  %v624_v11 = vmul.f32 1.0614054, %v4181_v58  ;;  %v783_v4 = vmul.f32 %v767_v19, %v543_v15  ;;  %3439 = vrcp.f32 %v578_v51  ;;  %3105 = vmatpush3.bf16.msra.mxu0 %v3102_v2 }
 0x20b   :  { %v889_v28 = vmul.f32 %v873_v26, %v4032_v18  ;;  %v731_v6 = vadd.f32 0.2548296, %v715_v59  ;;  %v653_v55 = vmul.f32 %v4175_v25, %v637_v9  ;;  %v561_v27 = vmul.f32 0.3275911, %v4185_v22 }
 0x20c   :  { %v860_v57 = vmul.f32 %v844_v20, %v4097_v60  ;;  %v702_v49 = vadd.f32 -0.28449672, %v686_v39  ;;  %3441 = vpow2.f32 %v807_v31  ;;  %v640_v56 = vadd.f32 -1.4531521, %v624_v11 }
 0x20d   :  { %v747_v7 = vmul.f32 %v4135_v13, %v731_v6  ;;  %v669_v35 = vadd.f32 1.4214138, %v653_v55  ;;  %3443 = vpow2.f32 %v813_v23  ;;  %v577_v14 = vadd.f32 1.0, %v561_v27 }
 0x20e   :  { %v4194_v15 = vpop.eup %3435  ;;  %v718_v38 = vmul.f32 %v4153_v17, %v702_v49  ;;  %v656_v18 = vmul.f32 %v4181_v58, %v640_v56  ;;  %v811_v21 = vmul.f32 1.442695, %v783_v4  ;;  %v3106_v16 = vpack.c.bf16 %v4133_v40, %v4147_v8 }
 0x20f   :  { %v827_v2 = vmul.f32 %v3434_v44, %v747_v7  ;;  %v685_v60 = vmul.f32 %v4175_v25, %v669_v35  ;;  %v623_v26 = vmul.f32 1.0614054, %v4194_v15  ;;  %v770_v13 = vsub.f32 0.0, %v4168_v12 }
 0x210   :  { %v876_v5 = vadd.f32 1.0, %v860_v57  ;;  %v734_v19 = vadd.f32 0.2548296, %v718_v38  ;;  %v672_v32 = vadd.f32 1.4214138, %v656_v18  ;;  %3445 = vrcp.f32 %v577_v14  ;;  %3107 = vmatprep.subr.bf16.mxu0 %v3106_v16 }
 0x211   :  { %v843_v62 = vsub.f32 1.0, %v827_v2  ;;  %v701_v10 = vadd.f32 -0.28449672, %v685_v60  ;;  %v639_v52 = vadd.f32 -1.4531521, %v623_v26  ;;  %3109 = vmatpush3.bf16.msra.mxu0 %v3106_v16  ;;  %v3110_v31 = vpack.c.bf16 %v4163_v3, %v889_v28 }
 0x212   :  { %v3438_v61 = vpop.eup %3437  ;;  %v523_v40 = vsel %vm507_vm11, 1.0, %v4881_v50  ;;  %v478_v8 = vmul.f32 0.5, %v4077_v24  ;;  %v750_v23 = vmul.f32 %v4153_v17, %v734_v19  ;;  %v688_v51 = vmul.f32 %v4181_v58, %v672_v32 }
 0x213   :  { %v859_v20 = vmul.f32 %v843_v62, %v523_v40  ;;  %vm510_vm12 = vcmp.ge.f32.partialorder %v4088_v45, 0.0  ;;  %v717_v59 = vmul.f32 %v4175_v25, %v701_v10  ;;  %v655_v9 = vmul.f32 %v4194_v15, %v639_v52  ;;  %3111 = vmatprep.subr.bf16.mxu0 %v3110_v31 }
 0x214   :  { %v4213_v3 = vpop.eup %3439  ;;  %v830_v44 = vmul.f32 %v3438_v61, %v750_v23  ;;  %v704_v39 = vadd.f32 -0.28449672, %v688_v51  ;;  %3447 = vpow2.f32 %v811_v21  ;;  %v786_v29 = vmul.f32 %v770_v13, %v4168_v12 }
 0x215   :  { %v892_v24 = vmul.f32 %v876_v5, %v4082_v54  ;;  %v875_v17 = vadd.f32 1.0, %v859_v20  ;;  %v733_v11 = vadd.f32 0.2548296, %v717_v59  ;;  %v671_v4 = vadd.f32 1.4214138, %v655_v9  ;;  %3113 = vmatpush3.bf16.msra.mxu0 %v3110_v31 }
 0x216   :  { %v3442_v28 = vpop.eup %3441  ;;  %v846_v6 = vsub.f32 1.0, %v830_v44  ;;  %v720_v55 = vmul.f32 %v4181_v58, %v704_v39  ;;  %v626_v27 = vmul.f32 1.0614054, %v4213_v3  ;;  %v769_v57 = vsub.f32 0.0, %v4185_v22 }
 0x217   :  { %v3444_v49 = vpop.eup %3443  ;;  %v891_v56 = vmul.f32 %v875_v17, %v4121_v41  ;;  %v526_v12 = vsel %vm510_vm12, 1.0, %v4881_v50  ;;  %v749_v54 = vmul.f32 %v4175_v25, %v733_v11  ;;  %v687_v7 = vmul.f32 %v4194_v15, %v671_v4 }
 0x218   :  { %v862_v35 = vmul.f32 %v846_v6, %v526_v12  ;;  %vm509_vm13 = vcmp.ge.f32.partialorder %v4109_v37, 0.0  ;;  %v736_v14 = vadd.f32 0.2548296, %v720_v55  ;;  %v642_v38 = vadd.f32 -1.4531521, %v626_v27 }
 0x219   :  { %v829_v18 = vmul.f32 %v3442_v28, %v749_v54  ;;  %v703_v21 = vadd.f32 -0.28449672, %v687_v7  ;;  %v817_v16 = vmul.f32 1.442695, %v786_v29  ;;  %v3114_v2 = vpack.c.bf16 %v892_v24, %v891_v56 }
 0x21a   :  { %v3446_v60 = vpop.eup %3445  ;;  %vm512_vm14 = vcmp.ge.f32.partialorder %v4117_v0, 0.0  ;;  %v752_v41 = vmul.f32 %v4181_v58, %v736_v14  ;;  %v658_v45 = vmul.f32 %v4213_v3, %v642_v38  ;;  %v785_v25 = vmul.f32 %v769_v57, %v4185_v22 }
 0x21b   :  { %v878_v26 = vadd.f32 1.0, %v862_v35  ;;  %v845_v13 = vsub.f32 1.0, %v829_v18  ;;  %v719_v5 = vmul.f32 %v4194_v15, %v703_v21  ;;  %v625_v19 = vmul.f32 1.0614054, %v3446_v60  ;;  %3115 = vmatprep.subr.bf16.mxu0 %v3114_v2 }
 0x21c   :  { %v477_v32 = vmul.f32 0.5, %v4092_v46  ;;  %v525_v62 = vsel %vm509_vm13, 1.0, %v4881_v50  ;;  %v832_v10 = vmul.f32 %v3444_v49, %v752_v41  ;;  %v674_v52 = vadd.f32 1.4214138, %v658_v45  ;;  %3117 = vmatpush3.bf16.msra.mxu0 %v3114_v2 }
 0x21d   :  { %v861_v58 = vmul.f32 %v845_v13, %v525_v62  ;;  %v735_v31 = vadd.f32 0.2548296, %v719_v5  ;;  %3449 = vpow2.f32 %v817_v16  ;;  %v641_v61 = vadd.f32 -1.4531521, %v625_v19 }
 0x21e   :  { %v3448_v22 = vpop.eup %3447  ;;  %v528_v40 = vsel %vm512_vm14, 1.0, %v4881_v50  ;;  %v848_v23 = vsub.f32 1.0, %v832_v10  ;;  %v690_v51 = vmul.f32 %v4213_v3, %v674_v52  ;;  %v815_v46 = vmul.f32 1.442695, %v785_v25  ;;  %v1103_v52 = vld [vmem:[%s4824_s8] sm:$0xff] }
 0x21f   :  { %v894_v20 = vmul.f32 %v878_v26, %v478_v8  ;;  %v877_v59 = vadd.f32 1.0, %v861_v58  ;;  %v751_v37 = vmul.f32 %v4194_v15, %v735_v31  ;;  %v657_v9 = vmul.f32 %v3446_v60, %v641_v61  ;;  %v1104_v58 = vld [vmem:[%s4824_s8 + $0x8] sm:$0xff]  ;;  %v1105_v61 = vld [vmem:[%s4824_s8 + $0x10] sm:$0xff] }
 0x220   :  { %v864_v44 = vmul.f32 %v848_v23, %v528_v40  ;;  %v706_v39 = vadd.f32 -0.28449672, %v690_v51  ;;  %vm511_vm15 = vcmp.ge.f32.partialorder %v4138_v1, 0.0  ;;  %3451 = vpow2.f32 %v815_v46  ;;  %v1107_v46 = vld [vmem:[%s4824_s8 + $0x20] sm:$0xff] }
 0x221   :  { %v893_v29 = vmul.f32 %v877_v59, %v477_v32  ;;  %v831_v24 = vmul.f32 %v3448_v22, %v751_v37  ;;  %v673_v17 = vadd.f32 1.4214138, %v657_v9  ;;  %v527_v8 = vsel %vm511_vm15, 1.0, %v4881_v50  ;;  %v1106_v22 = vld [vmem:[%s4824_s8 + $0x18] sm:$0xff] }
 0x222   :  { %v722_v11 = vmul.f32 %v4213_v3, %v706_v39  ;;  %v880_v0 = vadd.f32 1.0, %v864_v44  ;;  %v480_v15 = vmul.f32 0.5, %v4102_v47  ;;  %v479_v12 = vmul.f32 0.5, %v4130_v63  ;;  %v1109_v44 = vld [vmem:[%s4824_s8 + $0x30] sm:$0xff]  ;;  %v1110_v39 = vld [vmem:[%s4824_s8 + $0x38] sm:$0xff] }
 0x223   :  { %v847_v4 = vsub.f32 1.0, %v831_v24  ;;  %v689_v28 = vmul.f32 %v3446_v60, %v673_v17  ;;  %v3118_v6 = vpack.c.bf16 %v894_v20, %v893_v29  ;;  %vm514_vm2 = vcmp.ge.f32.partialorder %v4151_v43, 0.0  ;;  %v1108_v20 = vld [vmem:[%s4824_s8 + $0x28] sm:$0xff]  ;;  %v1111_v24 = vld [vmem:[%s4824_s8 + $0x40] sm:$0xff] }
 0x224   :  { %v738_v55 = vadd.f32 0.2548296, %v722_v11  ;;  %v896_v56 = vmul.f32 %v880_v0, %v480_v15  ;;  %v530_v47 = vsel %vm514_vm2, 1.0, %v4881_v50  ;;  %vm513_vm3 = vcmp.ge.f32.partialorder %v4173_v53, 0.0  ;;  %v989_v53 = vld [vmem:[%s4823_s5 + $0x8] sm:$0xff]  ;;  %v1113_v0 = vld [vmem:[%s4824_s8 + $0x50] sm:$0xff] }
 0x225   :  { %v863_v27 = vmul.f32 %v847_v4, %v527_v8  ;;  %v705_v57 = vadd.f32 -0.28449672, %v689_v28  ;;  %3119 = vmatprep.subr.bf16.mxu0 %v3118_v6  ;;  %v529_v25 = vsel %vm513_vm3, 1.0, %v4881_v50  ;;  %v482_v43 = vmul.f32 0.5, %v4142_v34  ;;  %v900_v50 = vld [vmem:[%s4822_s4 + $0x8] sm:$0xff]  ;;  %v901_v34 = vld [vmem:[%s4822_s4 + $0x10] sm:$0xff] }
 0x226   :  { %v754_v49 = vmul.f32 %v4213_v3, %v738_v55  ;;  %3121 = vmatpush3.bf16.msra.mxu0 %v3118_v6  ;;  %v481_v5 = vmul.f32 0.5, %v4160_v48  ;;  %v902_v48 = vld [vmem:[%s4822_s4 + $0x18] sm:$0xff]  ;;  %v3134_v31 = vpack.c.bf16 %v1104_v58, %v1103_v52  ;;  %v3138_v51 = vpack.c.bf16 %v1106_v22, %v1105_v61  ;;  %v1112_v17 = vld [vmem:[%s4824_s8 + $0x48] sm:$0xff]  ;;  %v1115_v6 = vld [vmem:[%s4824_s8 + $0x60] sm:$0xff] }
 0x227   :  { %v3450_v1 = vpop.eup %3449  ;;  %v879_v54 = vadd.f32 1.0, %v863_v27  ;;  %v721_v7 = vmul.f32 %v3446_v60, %v705_v57  ;;  %v3142_v9 = vpack.c.bf16 %v1108_v20, %v1107_v46  ;;  %v3146_v29 = vpack.c.bf16 %v1110_v39, %v1109_v44  ;;  %v1114_v4 = vld [vmem:[%s4824_s8 + $0x58] sm:$0xff]  ;;  %v1116_v8 = vld [vmem:[%s4824_s8 + $0x68] sm:$0xff]  ;;  %v1117_v15 = vld [vmem:[%s4824_s8 + $0x70] sm:$0xff] }
 0x228   :  { %v834_v35 = vmul.f32 %v3450_v1, %v754_v49  ;;  %v3150_v11 = vpack.c.bf16 %v1112_v17, %v1111_v24  ;;  %v3154_v28 = vpack.c.bf16 %v1114_v4, %v1113_v0  ;;  %v3158_v55 = vpack.c.bf16 %v1116_v8, %v1115_v6  ;;  %v1118_v27 = vld [vmem:[%s4824_s8 + $0x78] sm:$0xff]  ;;  %v2438_v49 = vld [vmem:[%s4825_s6] ss:$0 sm:$0xff] }
 0x229   :  { %v895_v14 = vmul.f32 %v879_v54, %v479_v12  ;;  %v737_v38 = vadd.f32 0.2548296, %v721_v7  ;;  %v3162_v57 = vpack.c.bf16 %v1118_v27, %v1117_v15  ;;  %v1095_v54 = vld [vmem:[%s4826_s7] sm:$0xff]  ;;  %v1096_v7 = vld [vmem:[%s4826_s7 + $0x8] sm:$0xff]  ;;  %v1211_v61 = vld [vmem:[%s4827_s9 + $0x18] sm:$0xff] }
 0x22a   :  { %v850_v18 = vsub.f32 1.0, %v834_v35  ;;  %v3452_v2 = vpop.eup %3451 }
 0x22b   :  { %v753_v21 = vmul.f32 %v3446_v60, %v737_v38  ;;  %v3122_v16 = vpack.c.bf16 %v896_v56, %v895_v14  ;;  %v988_v60 = vld [vmem:[%s4823_s5] sm:$0xff] }
 0x22c   :  { %v866_v41 = vmul.f32 %v850_v18, %v530_v47  ;;  %v3130_v10 = vpack.c.bf16 %v989_v53, %v988_v60  ;;  %v1098_v18 = vld [vmem:[%s4826_s7 + $0x18] sm:$0xff] }
 0x22d   :  { %v833_v3 = vmul.f32 %v3452_v2, %v753_v21  ;;  %3123 = vmatprep.subr.bf16.mxu0 %v3122_v16  ;;  %v1097_v2 = vld [vmem:[%s4826_s7 + $0x10] sm:$0xff] }
 0x22e   :  { %3125 = vmatpush3.bf16.msra.mxu0 %v3122_v16  ;;  %v882_v63 = vadd.f32 1.0, %v866_v41 }
 0x22f   :  { %v849_v45 = vsub.f32 1.0, %v833_v3 }
 0x230   :  { %v898_v13 = vmul.f32 %v882_v63, %v482_v43 }
 0x231   :  { %v865_v26 = vmul.f32 %v849_v45, %v529_v25 }
 0x233   :  { %v881_v19 = vadd.f32 1.0, %v865_v26 }
 0x235   :  { %v897_v32 = vmul.f32 %v881_v19, %v481_v5 }
 0x237   :  { %v3126_v62 = vpack.c.bf16 %v898_v13, %v897_v32 }
 0x239   :  { %3127 = vmatprep.subr.bf16.mxu0 %v3126_v62 }
 0x23a   :  { %3129 = vmatpush3.bf16.msra.mxu0 %v3126_v62  ;;  %v1209_v62 = vld [vmem:[%s4827_s9 + $0x8] sm:$0xff] }
 0x23b   :  { %3131 = vmatprep.subr.bf16.mxu0 %v3130_v10 }
 0x23d   :  { %2819 = vmatmul.mubr.f32.vlgmr.msra.gmra.mrb[16].mxu0 %v900_v50 }
 0x23e   :  { %2821 = vmatprep.mubr.f32.mxu0 %v901_v34  ;;  %3133 = vmatpush3.bf16.msra.mxu0 %v3130_v10  ;;  %v1208_v10 = vld [vmem:[%s4827_s9] sm:$0xff] }
 0x23f   :  { %3135 = vmatprep.subr.bf16.mxu0 %v3134_v31 }
 0x241   :  { %2822 = vmatmul.mubr.f32.gmra.mrb[18].mxu0 %v902_v48 }
 0x310   :  { %v2820_v40 = vpop.f32.mrb[16].mxu0 }
 0x311   :  { %v969_v23 = vpop.f32.mrb[17].mxu0 }
 0x312   :  { %2828 = vmatprep.mubr.msk.f32.mxu0 %vm997_vm4, %v969_v23 }
 0x313   :  { %2829 = vmatmul.mubr.msk.f32.vlgmr.msra.gmra.mrb[20].mxu0 %vm997_vm4, %v2820_v40  ;;  %v1210_v40 = vld [vmem:[%s4827_s9 + $0x10] sm:$0xff] }
 0x314   :  { %v2823_v59 = vpop.f32.mrb[18].mxu0  ;;  %3137 = vmatpush3.bf16.msra.mxu0 %v3134_v31 }
 0x315   :  { %v979_v37 = vpop.f32.mrb[19].mxu0  ;;  %3139 = vmatprep.subr.bf16.mxu0 %v3138_v51 }
 0x316   :  { %2831 = vmatprep.mubr.msk.f32.mxu0 %vm997_vm4, %v979_v37 }
 0x317   :  { %2832 = vmatmul.mubr.msk.f32.gmra.mrb[22].mxu0 %vm997_vm4, %v2823_v59 }
 0x318   :  { %3141 = vmatpush3.bf16.msra.mxu0 %v3138_v51 }
 0x319   :  { %3143 = vmatprep.subr.bf16.mxu0 %v3142_v9 }
 0x31c   :  { %3145 = vmatpush3.bf16.msra.mxu0 %v3142_v9 }
 0x31d   :  { %3147 = vmatprep.subr.bf16.mxu0 %v3146_v29 }
 0x320   :  { %3149 = vmatpush3.bf16.msra.mxu0 %v3146_v29 }
 0x321   :  { %3151 = vmatprep.subr.bf16.mxu0 %v3150_v11 }
 0x324   :  { %3153 = vmatpush3.bf16.msra.mxu0 %v3150_v11 }
 0x325   :  { %3155 = vmatprep.subr.bf16.mxu0 %v3154_v28 }
 0x328   :  { %3157 = vmatpush3.bf16.msra.mxu0 %v3154_v28 }
 0x329   :  { %3159 = vmatprep.subr.bf16.mxu0 %v3158_v55 }
 0x32c   :  { %3161 = vmatpush3.bf16.msra.mxu0 %v3158_v55 }
 0x32d   :  { %3163 = vmatprep.subr.bf16.mxu0 %v3162_v57 }
 0x330   :  { %3165 = vmatpush3.bf16.msra.mxu0 %v3162_v57 }
 0x3e6   :  { %v2830_v1 = vpop.f32.mrb[20].mxu0 }
 0x3e7   :  { %v1082_v56 = vadd.f32 %v2830_v1, %v2438_v49  ;;  %v1076_v12 = vpop.f32.mrb[21].mxu0 }
 0x3e8   :  { %v1077_v35 = vadd.f32 %v2438_v49, %v1076_v12 }
 0x3e9   :  { %v1100_v47 = vmul.f32 %v1096_v7, %v1082_v56 }
 0x3ea   :  { %v1099_v14 = vmul.f32 %v1095_v54, %v1077_v35  ;;  %v2833_v38 = vpop.f32.mrb[22].mxu0 }
 0x3eb   :  { %v1092_v21 = vadd.f32 %v2833_v38, %v2438_v49  ;;  %v1086_v16 = vpop.f32.mrb[23].mxu0 }
 0x3ec   :  { %2866 = vmatprep.mubr.f32.mxu0 %v1099_v14  ;;  %v1087_v41 = vadd.f32 %v2438_v49, %v1086_v16 }
 0x3ed   :  { %2867 = vmatmul.mubr.f32.vlgmr.msra.gmra.mrb[24].mxu0 %v1100_v47  ;;  %v1102_v3 = vmul.f32 %v1098_v18, %v1092_v21 }
 0x3ee   :  { %v1101_v63 = vmul.f32 %v1097_v2, %v1087_v41 }
 0x3f0   :  { %2869 = vmatprep.mubr.f32.mxu0 %v1101_v63 }
 0x3f1   :  { %2870 = vmatmul.mubr.f32.gmra.mrb[26].mxu0 %v1102_v3 }
 0x4c0   :  { %v2868_v45 = vpop.f32.mrb[24].mxu0 }
 0x4c1   :  { %v1205_v25 = vmul.f32 0.17677669, %v2868_v45  ;;  %v1185_v43 = vpop.f32.mrb[25].mxu0  ;;  %v4884_v45 = vld [vmem:[#allocation18_spill] sm:$0xff] }
 0x4c2   :  { %v1204_v26 = vmul.f32 0.17677669, %v1185_v43 }
 0x4c4   :  { %v4335_v13 = vpack.c.bf16 %v1205_v25, %v1204_v26  ;;  %2904 = vmatprep.mubr.msk.f32.mxu1 %vm69_vm0, %v1204_v26  ;;  %v2871_v5 = vpop.f32.mrb[26].mxu0 }
 0x4c5   :  { %2905 = vmatmul.mubr.msk.f32.vlgmr.msra.gmra.mrb[16].mxu1 %vm69_vm0, %v1205_v25  ;;  %v1207_v19 = vmul.f32 0.17677669, %v2871_v5  ;;  %v1195_v60 = vpop.f32.mrb[27].mxu0  ;;  %v4885_v25 = vld [vmem:[#allocation21_spill] sm:$0xff] }
 0x4c6   :  { %v1206_v53 = vmul.f32 0.17677669, %v1195_v60 }
 0x4c8   :  { %v4339_v32 = vpack.c.bf16 %v1207_v19, %v1206_v53  ;;  %2907 = vmatprep.mubr.msk.f32.mxu1 %vm69_vm0, %v1206_v53 }
 0x4c9   :  { %2908 = vmatmul.mubr.msk.f32.gmra.mrb[18].mxu1 %vm69_vm0, %v1207_v19 }
 0x598   :  { %v2906_v50 = vpop.f32.mrb[16].mxu1 }
 0x599   :  { %v1360_v34 = vadd.f32 %v2906_v50, %v1209_v62  ;;  %v1354_v48 = vpop.f32.mrb[17].mxu1 }
 0x59a   :  { %v1355_v52 = vadd.f32 %v1354_v48, %v1208_v10 }
 0x59b   :  { %1375 = vmax.xlane.f32.xlu1 %v1360_v34 }
 0x59c   :  { %1373 = vmax.xlane.f32.xlu0 %v1355_v52  ;;  %v2909_v58 = vpop.f32.mrb[18].mxu1 }
 0x59d   :  { %v1364_v31 = vpop.f32.mrb[19].mxu1  ;;  %v1370_v22 = vadd.f32 %v2909_v58, %v1211_v61 }
 0x5ac   :  { %3350 = vrot.lane.b32.xlu1 %v3712_v30, %s3535_s28  ;;  %v1365_v30 = vadd.f32 %v1364_v31, %v1210_v40 }
 0x5b0   :  { %3360 = vrot.lane.b32.xlu1 %v3740_v36, %s3535_s28  ;;  %v4882_v36 = vld [vmem:[#allocation10_spill] sm:$0xff] }
 0x5b2   :  { %3355 = vrot.lane.b32.xlu0 %v3726_v33, %s3535_s28  ;;  %v4883_v33 = vld [vmem:[#allocation15_spill] sm:$0xff] }
 0x5b4   :  { %3370 = vrot.lane.b32.xlu1 %v3768_v42, %s3535_s28 }
 0x5d1   :  { %1379 = vmax.xlane.f32.xlu0 %v1370_v22 }
 0x5d5   :  { %1377 = vmax.xlane.f32.xlu0 %v1365_v30 }
 0x5eb   :  { %3365 = vrot.lane.b32.xlu0 %v4882_v36, %s3535_s28 }
 0x5ef   :  { %3375 = vrot.lane.b32.xlu0 %v4883_v33, %s3535_s28 }
 0x628   :  { %v1376_v23 = vpop.xlane.xlu1 %1375 }
 0x629   :  { %v1382_v42 = vsub.f32 %v1360_v34, %v1376_v23  ;;  %v1374_v51 = vpop.xlane.xlu0 %1373 }
 0x62a   :  { %v1381_v46 = vsub.f32 %v1355_v52, %v1374_v51  ;;  %v4888_v51 = vld [vmem:[#allocation2_spill] sm:$0xff] }
 0x62b   :  { %v1387_v20 = vmul.f32 1.442695, %v1382_v42  ;;  %v4887_v42 = vld [vmem:[#allocation3_spill] sm:$0xff] }
 0x62c   :  { %v1385_v59 = vmul.f32 1.442695, %v1381_v46  ;;  %v3351_v37 = vpop.permute.xlu1 %3350  ;;  %v4889_v46 = vld [vmem:[#allocation5_spill] sm:$0xff] }
 0x62d   :  { %3453 = vpow2.f32 %v1387_v20  ;;  %v3353_v9 = vunpack.i.h.bf16 %v3351_v37  ;;  %v3352_v44 = vunpack.i.l.bf16 %v3351_v37  ;;  %v3356_v39 = vpop.permute.xlu0 %3355  ;;  %v4890_v20 = vld [vmem:[#allocation4_spill] sm:$0xff]  ;;  %v4893_v37 = vld [vmem:[#allocation9_spill] sm:$0xff] }
 0x62e   :  { %3455 = vpow2.f32 %v1385_v59  ;;  %v3358_v29 = vunpack.i.h.bf16 %v3356_v39  ;;  %v3357_v24 = vunpack.i.l.bf16 %v3356_v39  ;;  %v4891_v59 = vld [vmem:[#allocation7_spill] sm:$0xff]  ;;  %v4897_v39 = vld [vmem:[#allocation14_spill] sm:$0xff] }
 0x62f   :  { %v3214_v17 = vpack.c.bf16 %v3353_v9, %v3352_v44  ;;  %v4894_v9 = vld [vmem:[#allocation8_spill] sm:$0xff]  ;;  %v4896_v44 = vld [vmem:[#allocation11_spill] sm:$0xff] }
 0x630   :  { %v3218_v11 = vpack.c.bf16 %v3358_v29, %v3357_v24  ;;  %v3361_v0 = vpop.permute.xlu1 %3360  ;;  %v4898_v29 = vld [vmem:[#allocation13_spill] sm:$0xff] }
 0x631   :  { %v3363_v4 = vunpack.i.h.bf16 %v3361_v0  ;;  %v3362_v28 = vunpack.i.l.bf16 %v3361_v0  ;;  %3215 = vmatprep.subr.bf16.mxu0 %v3214_v17  ;;  %v4899_v24 = vld [vmem:[#allocation17_spill] sm:$0xff]  ;;  %v4902_v0 = vld [vmem:[#allocation19_spill] sm:$0xff] }
 0x632   :  { %3217 = vmatpush3.bf16.msra.mxu0 %v3214_v17  ;;  %v4900_v17 = vld [vmem:[#allocation16_spill] sm:$0xff] }
 0x633   :  { %3219 = vmatprep.subr.bf16.mxu0 %v3218_v11  ;;  %v3222_v6 = vpack.c.bf16 %v3363_v4, %v3362_v28 }
 0x634   :  { %v3371_v1 = vpop.permute.xlu1 %3370 }
 0x635   :  { %v3373_v54 = vunpack.i.h.bf16 %v3371_v1  ;;  %v3372_v35 = vunpack.i.l.bf16 %v3371_v1 }
 0x636   :  { %3221 = vmatpush3.bf16.msra.mxu0 %v3218_v11  ;;  %v4901_v11 = vld [vmem:[#allocation20_spill] sm:$0xff] }
 0x637   :  { %v4367_v8 = vpop.eup %3453  ;;  %3223 = vmatprep.subr.bf16.mxu0 %v3222_v6  ;;  %v3230_v21 = vpack.c.bf16 %v3373_v54, %v3372_v35  ;;  %v1545_v54 = vld [vmem:[%s4828_s10 + $0x18] sm:$0xff]  ;;  %v1544_v35 = vld [vmem:[%s4828_s10 + $0x10] sm:$0xff] }
 0x638   :  { %v3456_v55 = vpop.eup %3455  ;;  %1395 = vadd.xlane.f32.xlu0 %v4367_v8 }
 0x639   :  { %1393 = vadd.xlane.f32.xlu1 %v3456_v55 }
 0x63a   :  { %3225 = vmatpush3.bf16.msra.mxu0 %v3222_v6 }
 0x65e   :  { %v1380_v15 = vpop.xlane.xlu0 %1379 }
 0x65f   :  { %v1384_v27 = vsub.f32 %v1370_v22, %v1380_v15 }
 0x661   :  { %v1391_v57 = vmul.f32 1.442695, %v1384_v27  ;;  %v1543_v27 = vld [vmem:[%s4828_s10 + $0x8] sm:$0xff] }
 0x662   :  { %v1378_v49 = vpop.xlane.xlu0 %1377 }
 0x663   :  { %3457 = vpow2.f32 %v1391_v57  ;;  %v1383_v56 = vsub.f32 %v1365_v30, %v1378_v49  ;;  %v1542_v57 = vld [vmem:[%s4828_s10] sm:$0xff] }
 0x665   :  { %v1389_v12 = vmul.f32 1.442695, %v1383_v56 }
 0x666   :  { %v3366_v7 = vpop.permute.xlu0 %3365 }
 0x667   :  { %3459 = vpow2.f32 %v1389_v12  ;;  %v3368_v14 = vunpack.i.h.bf16 %v3366_v7  ;;  %v3367_v38 = vunpack.i.l.bf16 %v3366_v7 }
 0x669   :  { %v3226_v18 = vpack.c.bf16 %v3368_v14, %v3367_v38 }
 0x66a   :  { %v3376_v47 = vpop.permute.xlu0 %3375 }
 0x66b   :  { %v3378_v16 = vunpack.i.h.bf16 %v3376_v47  ;;  %v3377_v2 = vunpack.i.l.bf16 %v3376_v47  ;;  %3227 = vmatprep.subr.bf16.mxu0 %v3226_v18 }
 0x66c   :  { %3229 = vmatpush3.bf16.msra.mxu0 %v3226_v18 }
 0x66d   :  { %v3458_v41 = vpop.eup %3457  ;;  %3231 = vmatprep.subr.bf16.mxu0 %v3230_v21  ;;  %v3234_v3 = vpack.c.bf16 %v3378_v16, %v3377_v2  ;;  %v1547_v16 = vld [vmem:[%s4828_s10 + $0x28] sm:$0xff] }
 0x66e   :  { %1399 = vadd.xlane.f32.xlu0 %v3458_v41 }
 0x670   :  { %3233 = vmatpush3.bf16.msra.mxu0 %v3230_v21 }
 0x671   :  { %v3460_v63 = vpop.eup %3459  ;;  %3235 = vmatprep.subr.bf16.mxu0 %v3234_v3 }
 0x672   :  { %1397 = vadd.xlane.f32.xlu1 %v3460_v63 }
 0x674   :  { %3237 = vmatpush3.bf16.msra.mxu0 %v3234_v3 }
 0x683   :  { %3380 = vrot.lane.b32.xlu1 %v4884_v45, %s3535_s28 }
 0x684   :  { %3385 = vrot.lane.b32.xlu0 %v4885_v25, %s3535_s28 }
 0x6c5   :  { %v1396_v19 = vpop.xlane.xlu0 %1395 }
 0x6c6   :  { %v1394_v43 = vpop.xlane.xlu1 %1393 }
 0x6c7   :  { %3461 = vrcp.f32 %v1394_v43 }
 0x6c8   :  { %3463 = vrcp.f32 %v1396_v19 }
 0x6d1   :  { %v3462_v26 = vpop.eup %3461 }
 0x6d2   :  { %v4374_v5 = vmul.f32 %v3462_v26, %v3456_v55  ;;  %v3464_v61 = vpop.eup %3463  ;;  %v1549_v26 = vld [vmem:[%s4828_s10 + $0x38] sm:$0xff] }
 0x6d3   :  { %v4378_v40 = vmul.f32 %v3464_v61, %v4367_v8 }
 0x6d4   :  { %2942 = vmatprep.mubr.f32.mxu0 %v4374_v5 }
 0x6fb   :  { %v1400_v60 = vpop.xlane.xlu0 %1399 }
 0x6ff   :  { %v1398_v53 = vpop.xlane.xlu1 %1397  ;;  %v3386_v62 = vpop.permute.xlu0 %3385 }
 0x700   :  { %3465 = vrcp.f32 %v1398_v53  ;;  %v3388_v50 = vunpack.i.h.bf16 %v3386_v62  ;;  %v3387_v34 = vunpack.i.l.bf16 %v3386_v62 }
 0x701   :  { %3467 = vrcp.f32 %v1400_v60  ;;  %v1548_v60 = vld [vmem:[%s4828_s10 + $0x30] sm:$0xff] }
 0x702   :  { %v3242_v31 = vpack.c.bf16 %v3388_v50, %v3387_v34 }
 0x703   :  { %v3381_v10 = vpop.permute.xlu1 %3380 }
 0x704   :  { %v3383_v48 = vunpack.i.h.bf16 %v3381_v10  ;;  %v3382_v52 = vunpack.i.l.bf16 %v3381_v10 }
 0x706   :  { %v3238_v58 = vpack.c.bf16 %v3383_v48, %v3382_v52  ;;  %v1551_v48 = vld [vmem:[%s4828_s10 + $0x48] sm:$0xff] }
 0x708   :  { %3239 = vmatprep.subr.bf16.mxu0 %v3238_v58 }
 0x709   :  { %3241 = vmatpush3.bf16.msra.mxu0 %v3238_v58  ;;  %v1550_v58 = vld [vmem:[%s4828_s10 + $0x40] sm:$0xff] }
 0x70a   :  { %3243 = vmatprep.subr.bf16.mxu0 %v3242_v31  ;;  %v3466_v22 = vpop.eup %3465 }
 0x70b   :  { %v3468_v36 = vpop.eup %3467  ;;  %v4383_v33 = vmul.f32 %v3466_v22, %v3460_v63 }
 0x70c   :  { %v4387_v23 = vmul.f32 %v3468_v36, %v3458_v41  ;;  %v1546_v41 = vld [vmem:[%s4828_s10 + $0x20] sm:$0xff] }
 0x70d   :  { %3245 = vmatpush3.bf16.msra.mxu0 %v3242_v31 }
 0x70e   :  { %3248 = vmatprep.subr.msk.bf16.mxu0 %vm3818_vm1, %v4335_v13 }
 0x710   :  { %2943 = vmatmul.mubr.f32.vlgmr.msra.gmra.mrb[28].mxu0 %v4378_v40 }
 0x711   :  { %2945 = vmatprep.mubr.f32.mxu0 %v4383_v33 }
 0x714   :  { %2946 = vmatmul.mubr.f32.gmra.mrb[30].mxu0 %v4387_v23 }
 0x715   :  { %2956 = vmatprep.mubr.msk.f32.mxu0 %vm69_vm0, %v4887_v42  ;;  %v1553_v42 = vld [vmem:[%s4828_s10 + $0x58] sm:$0xff] }
 0x716   :  { %3251 = vmatpush3.bf16.xpose.msk.msra.mxu0 %vm3818_vm1, %v4335_v13  ;;  %v4892_v13 = vld [vmem:[#allocation6_spill] sm:$0xff] }
 0x717   :  { %3254 = vmatprep.subr.msk.bf16.mxu0 %vm3818_vm1, %v4339_v32 }
 0x71e   :  { %3257 = vmatpush3.bf16.xpose.msk.msra.mxu0 %vm3818_vm1, %v4339_v32  ;;  %v4895_v32 = vld [vmem:[#allocation12_spill] sm:$0xff] }
 0x725   :  { %2957 = vmatmul.mubr.msk.f32.vlgmr.msra.gmra.mrb[32].mxu0 %vm69_vm0, %v4888_v51 }
 0x726   :  { %2959 = vmatprep.mubr.msk.f32.mxu0 %vm69_vm0, %v4889_v46  ;;  %v1552_v46 = vld [vmem:[%s4828_s10 + $0x50] sm:$0xff] }
 0x729   :  { %2960 = vmatmul.mubr.msk.f32.gmra.mrb[34].mxu0 %vm69_vm0, %v4890_v20 }
 0x72a   :  { %2962 = vmatprep.mubr.msk.f32.mxu0 %vm69_vm0, %v4891_v59 }
 0x72d   :  { %2963 = vmatmul.mubr.msk.f32.gmra.mrb[36].mxu0 %vm69_vm0, %v4892_v13 }
 0x72e   :  { %2965 = vmatprep.mubr.msk.f32.mxu0 %vm69_vm0, %v4893_v37 }
 0x731   :  { %2966 = vmatmul.mubr.msk.f32.gmra.mrb[38].mxu0 %vm69_vm0, %v4894_v9 }
 0x732   :  { %2968 = vmatprep.mubr.msk.f32.mxu0 %vm69_vm0, %v4895_v32  ;;  %v1555_v32 = vld [vmem:[%s4828_s10 + $0x68] sm:$0xff] }
 0x735   :  { %2969 = vmatmul.mubr.msk.f32.gmra.mrb[40].mxu0 %vm69_vm0, %v4896_v44 }
 0x736   :  { %2971 = vmatprep.mubr.msk.f32.mxu0 %vm69_vm0, %v4897_v39  ;;  %v1554_v39 = vld [vmem:[%s4828_s10 + $0x60] sm:$0xff] }
 0x739   :  { %2972 = vmatmul.mubr.msk.f32.gmra.mrb[42].mxu0 %vm69_vm0, %v4898_v29 }
 0x73a   :  { %2974 = vmatprep.mubr.msk.f32.mxu0 %vm69_vm0, %v4899_v24 }
 0x73d   :  { %2975 = vmatmul.mubr.msk.f32.gmra.mrb[44].mxu0 %vm69_vm0, %v4900_v17 }
 0x73e   :  { %2977 = vmatprep.mubr.msk.f32.mxu0 %vm69_vm0, %v4901_v11 }
 0x741   :  { %2978 = vmatmul.mubr.msk.f32.gmra.mrb[46].mxu0 %vm69_vm0, %v4902_v0 }
 0x7e3   :  { %v2944_v4 = vpop.f32.mrb[28].mxu0 }
 0x7e4   :  { %v1523_v28 = vpop.f32.mrb[29].mxu0 }
 0x7e5   :  { %v3258_v6 = vpack.c.bf16 %v2944_v4, %v1523_v28  ;;  %v1557_v4 = vld [vmem:[%s4828_s10 + $0x78] sm:$0xff] }
 0x7e7   :  { %v2947_v8 = vpop.f32.mrb[30].mxu0  ;;  %3259 = vmatprep.subr.bf16.mxu1 %v3258_v6 }
 0x7e8   :  { %v1533_v55 = vpop.f32.mrb[31].mxu0  ;;  %3261 = vmatpush3.bf16.msra.mxu1 %v3258_v6  ;;  %v1556_v6 = vld [vmem:[%s4828_s10 + $0x70] sm:$0xff] }
 0x7e9   :  { %v3262_v15 = vpack.c.bf16 %v2947_v8, %v1533_v55 }
 0x7eb   :  { %3263 = vmatprep.subr.bf16.mxu1 %v3262_v15 }
 0x7ec   :  { %3265 = vmatpush3.bf16.msra.mxu1 %v3262_v15 }
 0x7f8   :  { %v2958_v49 = vpop.f32.mrb[32].mxu0 }
 0x7f9   :  { %v4437_v1 = vadd.f32 %v2958_v49, %v1543_v27  ;;  %v1624_v56 = vpop.f32.mrb[33].mxu0 }
 0x7fa   :  { %v4439_v12 = vadd.f32 %v1624_v56, %v1542_v57 }
 0x7fb   :  { %v1706_v7 = vsel %vm69_vm0, %v4437_v1, -inf }
 0x7fc   :  { %1707 = vmax.xlane.f32.xlu0 %v1706_v7  ;;  %v2961_v14 = vpop.f32.mrb[34].mxu0  ;;  %v1703_v38 = vsel %vm69_vm0, %v4439_v12, -inf }
 0x7fd   :  { %v4451_v18 = vadd.f32 %v2961_v14, %v1545_v54  ;;  %v1634_v47 = vpop.f32.mrb[35].mxu0  ;;  %1704 = vmax.xlane.f32.xlu1 %v1703_v38 }
 0x7fe   :  { %v4453_v21 = vadd.f32 %v1634_v47, %v1544_v35 }
 0x7ff   :  { %v1712_v2 = vsel %vm69_vm0, %v4451_v18, -inf }
 0x800   :  { %1713 = vmax.xlane.f32.xlu0 %v1712_v2  ;;  %v2964_v3 = vpop.f32.mrb[36].mxu0  ;;  %v1709_v63 = vsel %vm69_vm0, %v4453_v21, -inf }
 0x801   :  { %v4465_v45 = vadd.f32 %v2964_v3, %v1547_v16  ;;  %v1644_v25 = vpop.f32.mrb[37].mxu0  ;;  %1710 = vmax.xlane.f32.xlu1 %v1709_v63 }
 0x802   :  { %v4467_v43 = vadd.f32 %v1644_v25, %v1546_v41 }
 0x803   :  { %v1718_v19 = vsel %vm69_vm0, %v4465_v45, -inf }
 0x804   :  { %1719 = vmax.xlane.f32.xlu0 %v1718_v19  ;;  %v2967_v53 = vpop.f32.mrb[38].mxu0  ;;  %v1715_v62 = vsel %vm69_vm0, %v4467_v43, -inf }
 0x805   :  { %v4479_v10 = vadd.f32 %v2967_v53, %v1549_v26  ;;  %v1654_v50 = vpop.f32.mrb[39].mxu0  ;;  %1716 = vmax.xlane.f32.xlu1 %v1715_v62 }
 0x806   :  { %v4481_v34 = vadd.f32 %v1654_v50, %v1548_v60 }
 0x807   :  { %v1724_v52 = vsel %vm69_vm0, %v4479_v10, -inf }
 0x808   :  { %1725 = vmax.xlane.f32.xlu0 %v1724_v52  ;;  %v2970_v31 = vpop.f32.mrb[40].mxu0  ;;  %v1721_v61 = vsel %vm69_vm0, %v4481_v34, -inf }
 0x809   :  { %v4493_v22 = vadd.f32 %v2970_v31, %v1551_v48  ;;  %v1664_v30 = vpop.f32.mrb[41].mxu0  ;;  %1722 = vmax.xlane.f32.xlu1 %v1721_v61 }
 0x80a   :  { %v4495_v36 = vadd.f32 %v1664_v30, %v1550_v58 }
 0x80b   :  { %v1730_v51 = vsel %vm69_vm0, %v4493_v22, -inf }
 0x80c   :  { %1731 = vmax.xlane.f32.xlu0 %v1730_v51  ;;  %v2973_v20 = vpop.f32.mrb[42].mxu0  ;;  %v1727_v59 = vsel %vm69_vm0, %v4495_v36, -inf }
 0x80d   :  { %v4507_v13 = vadd.f32 %v2973_v20, %v1553_v42  ;;  %v1674_v37 = vpop.f32.mrb[43].mxu0  ;;  %1728 = vmax.xlane.f32.xlu1 %v1727_v59 }
 0x80e   :  { %v4509_v9 = vadd.f32 %v1674_v37, %v1552_v46 }
 0x80f   :  { %v1736_v44 = vsel %vm69_vm0, %v4507_v13, -inf }
 0x810   :  { %1737 = vmax.xlane.f32.xlu0 %v1736_v44  ;;  %v2976_v29 = vpop.f32.mrb[44].mxu0  ;;  %v1733_v24 = vsel %vm69_vm0, %v4509_v9, -inf }
 0x811   :  { %v4521_v17 = vadd.f32 %v2976_v29, %v1555_v32  ;;  %v1684_v11 = vpop.f32.mrb[45].mxu0  ;;  %1734 = vmax.xlane.f32.xlu1 %v1733_v24 }
 0x812   :  { %v4523_v0 = vadd.f32 %v1684_v11, %v1554_v39 }
 0x813   :  { %v1742_v28 = vsel %vm69_vm0, %v4521_v17, -inf }
 0x814   :  { %1743 = vmax.xlane.f32.xlu0 %v1742_v28  ;;  %v2979_v8 = vpop.f32.mrb[46].mxu0  ;;  %v1739_v55 = vsel %vm69_vm0, %v4523_v0, -inf }
 0x815   :  { %v4535_v15 = vadd.f32 %v2979_v8, %v1557_v4  ;;  %v1694_v27 = vpop.f32.mrb[47].mxu0  ;;  %1740 = vmax.xlane.f32.xlu1 %v1739_v55 }
 0x816   :  { %v4537_v57 = vadd.f32 %v1694_v27, %v1556_v6 }
 0x817   :  { %v1748_v49 = vsel %vm69_vm0, %v4535_v15, -inf }
 0x818   :  { %1749 = vmax.xlane.f32.xlu0 %v1748_v49  ;;  %v1745_v56 = vsel %vm69_vm0, %v4537_v57, -inf }
 0x819   :  { %1746 = vmax.xlane.f32.xlu1 %v1745_v56 }
 0x889   :  { %v1708_v54 = vpop.xlane.xlu0 %1707 }
 0x88a   :  { %v1752_v7 = vsub.f32 %v4437_v1, %v1708_v54  ;;  %v1705_v35 = vpop.xlane.xlu1 %1704 }
 0x88b   :  { %v1751_v14 = vsub.f32 %v4439_v12, %v1705_v35 }
 0x88c   :  { %v1769_v38 = vmul.f32 1.442695, %v1752_v7 }
 0x88d   :  { %v1767_v47 = vmul.f32 1.442695, %v1751_v14  ;;  %v1714_v16 = vpop.xlane.xlu0 %1713 }
 0x88e   :  { %3469 = vpow2.f32 %v1769_v38  ;;  %v1754_v2 = vsub.f32 %v4451_v18, %v1714_v16  ;;  %v1711_v41 = vpop.xlane.xlu1 %1710 }
 0x88f   :  { %3471 = vpow2.f32 %v1767_v47  ;;  %v1753_v3 = vsub.f32 %v4453_v21, %v1711_v41 }
 0x890   :  { %v1773_v63 = vmul.f32 1.442695, %v1754_v2 }
 0x891   :  { %v1771_v25 = vmul.f32 1.442695, %v1753_v3  ;;  %v1720_v26 = vpop.xlane.xlu0 %1719 }
 0x892   :  { %3473 = vpow2.f32 %v1773_v63  ;;  %v1756_v19 = vsub.f32 %v4465_v45, %v1720_v26  ;;  %v1717_v1 = vpop.xlane.xlu1 %1716 }
 0x893   :  { %3475 = vpow2.f32 %v1771_v25  ;;  %v1755_v12 = vsub.f32 %v4467_v43, %v1717_v1 }
 0x894   :  { %v1777_v60 = vmul.f32 1.442695, %v1756_v19 }
 0x895   :  { %v1775_v53 = vmul.f32 1.442695, %v1755_v12  ;;  %v1726_v62 = vpop.xlane.xlu0 %1725 }
 0x896   :  { %3477 = vpow2.f32 %v1777_v60  ;;  %v1758_v18 = vsub.f32 %v4479_v10, %v1726_v62  ;;  %v1723_v50 = vpop.xlane.xlu1 %1722 }
 0x897   :  { %3479 = vpow2.f32 %v1775_v53  ;;  %v1757_v21 = vsub.f32 %v4481_v34, %v1723_v50  ;;  %v2072_v50 = vld [vmem:[%s4829_s12] sm:$0xff] }
 0x898   :  { %v4551_v48 = vpop.eup %3469  ;;  %v1781_v52 = vmul.f32 1.442695, %v1758_v18 }
 0x899   :  { %v4553_v58 = vpop.eup %3471  ;;  %v1779_v45 = vmul.f32 1.442695, %v1757_v21  ;;  %v1732_v31 = vpop.xlane.xlu0 %1731  ;;  %v1802_v43 = vsel %vm69_vm0, %v4551_v48, 0.0  ;;  %v2073_v21 = vld [vmem:[%s4829_s12 + $0x8] sm:$0xff] }
 0x89a   :  { %3481 = vpow2.f32 %v1781_v52  ;;  %v1760_v61 = vsub.f32 %v4493_v22, %v1732_v31  ;;  %1803 = vadd.xlane.f32.xlu0 %v1802_v43  ;;  %v1729_v30 = vpop.xlane.xlu1 %1728  ;;  %v1799_v10 = vsel %vm69_vm0, %v4553_v58, 0.0  ;;  %v3266_v52 = vpack.c.bf16 %v2073_v21, %v2072_v50 }
 0x89b   :  { %3483 = vpow2.f32 %v1779_v45  ;;  %v1759_v34 = vsub.f32 %v4495_v36, %v1729_v30  ;;  %1800 = vadd.xlane.f32.xlu1 %v1799_v10 }
 0x89c   :  { %v4561_v42 = vpop.eup %3473  ;;  %v1785_v51 = vmul.f32 1.442695, %v1760_v61  ;;  %3267 = vmatprep.subr.bf16.mxu1 %v3266_v52 }
 0x89d   :  { %v4563_v46 = vpop.eup %3475  ;;  %v1783_v20 = vmul.f32 1.442695, %v1759_v34  ;;  %v1738_v59 = vpop.xlane.xlu0 %1737  ;;  %v1808_v37 = vsel %vm69_vm0, %v4561_v42, 0.0 }
 0x89e   :  { %3485 = vpow2.f32 %v1785_v51  ;;  %v1762_v22 = vsub.f32 %v4507_v13, %v1738_v59  ;;  %1809 = vadd.xlane.f32.xlu0 %v1808_v37  ;;  %v1735_v32 = vpop.xlane.xlu1 %1734  ;;  %v1805_v44 = vsel %vm69_vm0, %v4563_v46, 0.0  ;;  %v2074_v51 = vld [vmem:[%s4829_s12 + $0x10] sm:$0xff] }
 0x89f   :  { %3487 = vpow2.f32 %v1783_v20  ;;  %v1761_v36 = vsub.f32 %v4509_v9, %v1735_v32  ;;  %1806 = vadd.xlane.f32.xlu1 %v1805_v44  ;;  %v2075_v20 = vld [vmem:[%s4829_s12 + $0x18] sm:$0xff] }
 0x8a0   :  { %v4571_v39 = vpop.eup %3477  ;;  %v1789_v29 = vmul.f32 1.442695, %v1762_v22 }
 0x8a1   :  { %v4573_v24 = vpop.eup %3479  ;;  %v1787_v11 = vmul.f32 1.442695, %v1761_v36  ;;  %v1744_v4 = vpop.xlane.xlu0 %1743  ;;  %v1814_v28 = vsel %vm69_vm0, %v4571_v39, 0.0  ;;  %v3270_v36 = vpack.c.bf16 %v2075_v20, %v2074_v51 }
 0x8a2   :  { %3489 = vpow2.f32 %v1789_v29  ;;  %v1764_v13 = vsub.f32 %v4521_v17, %v1744_v4  ;;  %1815 = vadd.xlane.f32.xlu0 %v1814_v28  ;;  %v1741_v6 = vpop.xlane.xlu1 %1740  ;;  %v1811_v8 = vsel %vm69_vm0, %v4573_v24, 0.0 }
 0x8a3   :  { %3491 = vpow2.f32 %v1787_v11  ;;  %v1763_v9 = vsub.f32 %v4523_v0, %v1741_v6  ;;  %1812 = vadd.xlane.f32.xlu1 %v1811_v8 }
 0x8a4   :  { %v4581_v55 = vpop.eup %3481  ;;  %v1793_v27 = vmul.f32 1.442695, %v1764_v13 }
 0x8a5   :  { %v4583_v49 = vpop.eup %3483  ;;  %v1791_v56 = vmul.f32 1.442695, %v1763_v9  ;;  %v1750_v54 = vpop.xlane.xlu0 %1749  ;;  %v1820_v7 = vsel %vm69_vm0, %v4581_v55, 0.0 }
 0x8a6   :  { %3493 = vpow2.f32 %v1793_v27  ;;  %v1766_v17 = vsub.f32 %v4535_v15, %v1750_v54  ;;  %1821 = vadd.xlane.f32.xlu0 %v1820_v7  ;;  %v1747_v35 = vpop.xlane.xlu1 %1746  ;;  %v1817_v14 = vsel %vm69_vm0, %v4583_v49, 0.0 }
 0x8a7   :  { %3495 = vpow2.f32 %v1791_v56  ;;  %v1765_v0 = vsub.f32 %v4537_v57, %v1747_v35  ;;  %1818 = vadd.xlane.f32.xlu1 %v1817_v14 }
 0x8a8   :  { %v4591_v38 = vpop.eup %3485  ;;  %v1797_v47 = vmul.f32 1.442695, %v1766_v17 }
 0x8a9   :  { %v4593_v16 = vpop.eup %3487  ;;  %v1795_v2 = vmul.f32 1.442695, %v1765_v0  ;;  %v1826_v41 = vsel %vm69_vm0, %v4591_v38, 0.0 }
 0x8aa   :  { %3497 = vpow2.f32 %v1797_v47  ;;  %1827 = vadd.xlane.f32.xlu0 %v1826_v41  ;;  %v1823_v15 = vsel %vm69_vm0, %v4593_v16, 0.0 }
 0x8ab   :  { %3499 = vpow2.f32 %v1795_v2  ;;  %1824 = vadd.xlane.f32.xlu1 %v1823_v15 }
 0x8ac   :  { %v4599_v3 = vpop.eup %3489 }
 0x8ad   :  { %v4601_v57 = vpop.eup %3491  ;;  %v1832_v63 = vsel %vm69_vm0, %v4599_v3, 0.0 }
 0x8ae   :  { %1833 = vadd.xlane.f32.xlu0 %v1832_v63  ;;  %v1829_v25 = vsel %vm69_vm0, %v4601_v57, 0.0 }
 0x8af   :  { %1830 = vadd.xlane.f32.xlu1 %v1829_v25 }
 0x8b0   :  { %v4607_v26 = vpop.eup %3493 }
 0x8b1   :  { %v4609_v19 = vpop.eup %3495  ;;  %v1838_v1 = vsel %vm69_vm0, %v4607_v26, 0.0 }
 0x8b2   :  { %1839 = vadd.xlane.f32.xlu0 %v1838_v1  ;;  %v1835_v12 = vsel %vm69_vm0, %v4609_v19, 0.0 }
 0x8b3   :  { %1836 = vadd.xlane.f32.xlu1 %v1835_v12 }
 0x8b4   :  { %v4615_v60 = vpop.eup %3497 }
 0x8b5   :  { %v4617_v53 = vpop.eup %3499  ;;  %v1844_v62 = vsel %vm69_vm0, %v4615_v60, 0.0 }
 0x8b6   :  { %1845 = vadd.xlane.f32.xlu0 %v1844_v62  ;;  %v1841_v18 = vsel %vm69_vm0, %v4617_v53, 0.0 }
 0x8b7   :  { %1842 = vadd.xlane.f32.xlu1 %v1841_v18 }
 0x927   :  { %v1804_v45 = vpop.xlane.xlu0 %1803 }
 0x928   :  { %3501 = vrcp.f32 %v1804_v45  ;;  %v1801_v31 = vpop.xlane.xlu1 %1800  ;;  %v2297_v45 = vld [vmem:[%s4830_s11 + $0x28] sm:$0xff] }
 0x929   :  { %3503 = vrcp.f32 %v1801_v31 }
 0x92b   :  { %v1810_v43 = vpop.xlane.xlu0 %1809 }
 0x92c   :  { %3505 = vrcp.f32 %v1810_v43  ;;  %v1807_v61 = vpop.xlane.xlu1 %1806 }
 0x92d   :  { %3507 = vrcp.f32 %v1807_v61 }
 0x92f   :  { %v1816_v30 = vpop.xlane.xlu0 %1815 }
 0x930   :  { %3509 = vrcp.f32 %v1816_v30  ;;  %v1813_v10 = vpop.xlane.xlu1 %1812  ;;  %v2298_v30 = vld [vmem:[%s4830_s11 + $0x30] sm:$0xff] }
 0x931   :  { %3511 = vrcp.f32 %v1813_v10  ;;  %v2299_v10 = vld [vmem:[%s4830_s11 + $0x38] sm:$0xff] }
 0x932   :  { %v3502_v34 = vpop.eup %3501  ;;  %v3286_v20 = vpack.c.bf16 %v2299_v10, %v2298_v30 }
 0x933   :  { %v3504_v59 = vpop.eup %3503  ;;  %v1822_v37 = vpop.xlane.xlu0 %1821  ;;  %v1850_v44 = vmul.f32 %v3502_v34, %v4551_v48 }
 0x934   :  { %3513 = vrcp.f32 %v1822_v37  ;;  %v1819_v22 = vpop.xlane.xlu1 %1818  ;;  %v1848_v32 = vmul.f32 %v3504_v59, %v4553_v58  ;;  %v2300_v59 = vld [vmem:[%s4830_s11 + $0x40] sm:$0xff]  ;;  %v2301_v37 = vld [vmem:[%s4830_s11 + $0x48] sm:$0xff] }
 0x935   :  { %3515 = vrcp.f32 %v1819_v22 }
 0x936   :  { %v3506_v29 = vpop.eup %3505  ;;  %2988 = vmatprep.mubr.msk.f32.mxu1 %vm69_vm0, %v1848_v32 }
 0x937   :  { %v3508_v11 = vpop.eup %3507  ;;  %v1828_v4 = vpop.xlane.xlu0 %1827  ;;  %2989 = vmatmul.mubr.msk.f32.vlgmr.msra.gmra.mrb[20].mxu1 %vm69_vm0, %v1850_v44  ;;  %v1854_v6 = vmul.f32 %v3506_v29, %v4561_v42  ;;  %v3290_v44 = vpack.c.bf16 %v2301_v37, %v2300_v59  ;;  %v2303_v29 = vld [vmem:[%s4830_s11 + $0x58] sm:$0xff] }
 0x938   :  { %3517 = vrcp.f32 %v1828_v4  ;;  %v1825_v28 = vpop.xlane.xlu1 %1824  ;;  %v1852_v13 = vmul.f32 %v3508_v11, %v4563_v46  ;;  %3269 = vmatpush3.bf16.msra.mxu1 %v3266_v52  ;;  %v2296_v52 = vld [vmem:[%s4830_s11 + $0x20] sm:$0xff] }
 0x939   :  { %3519 = vrcp.f32 %v1825_v28  ;;  %3271 = vmatprep.subr.bf16.mxu1 %v3270_v36  ;;  %v3282_v61 = vpack.c.bf16 %v2297_v45, %v2296_v52 }
 0x93a   :  { %v3510_v58 = vpop.eup %3509  ;;  %2991 = vmatprep.mubr.msk.f32.mxu1 %vm69_vm0, %v1852_v13  ;;  %v2304_v13 = vld [vmem:[%s4830_s11 + $0x60] sm:$0xff] }
 0x93b   :  { %v3512_v48 = vpop.eup %3511  ;;  %v1834_v8 = vpop.xlane.xlu0 %1833  ;;  %2992 = vmatmul.mubr.msk.f32.gmra.mrb[22].mxu1 %vm69_vm0, %v1854_v6  ;;  %v1858_v46 = vmul.f32 %v3510_v58, %v4571_v39  ;;  %v2305_v6 = vld [vmem:[%s4830_s11 + $0x68] sm:$0xff] }
 0x93c   :  { %3521 = vrcp.f32 %v1834_v8  ;;  %v1831_v9 = vpop.xlane.xlu1 %1830  ;;  %v1856_v27 = vmul.f32 %v3512_v48, %v4573_v24  ;;  %3273 = vmatpush3.bf16.msra.mxu1 %v3270_v36  ;;  %v2302_v36 = vld [vmem:[%s4830_s11 + $0x50] sm:$0xff]  ;;  %v3298_v8 = vpack.c.bf16 %v2305_v6, %v2304_v13 }
 0x93d   :  { %3523 = vrcp.f32 %v1831_v9  ;;  %v3294_v28 = vpack.c.bf16 %v2303_v29, %v2302_v36  ;;  %v2306_v9 = vld [vmem:[%s4830_s11 + $0x70] sm:$0xff] }
 0x93e   :  { %v3514_v56 = vpop.eup %3513  ;;  %2994 = vmatprep.mubr.msk.f32.mxu1 %vm69_vm0, %v1856_v27  ;;  %v2307_v27 = vld [vmem:[%s4830_s11 + $0x78] sm:$0xff] }
 0x93f   :  { %v3516_v42 = vpop.eup %3515  ;;  %v1840_v54 = vpop.xlane.xlu0 %1839  ;;  %2995 = vmatmul.mubr.msk.f32.gmra.mrb[24].mxu1 %vm69_vm0, %v1858_v46  ;;  %v1862_v35 = vmul.f32 %v3514_v56, %v4581_v55 }
 0x940   :  { %3525 = vrcp.f32 %v1840_v54  ;;  %v1837_v7 = vpop.xlane.xlu1 %1836  ;;  %v1860_v17 = vmul.f32 %v3516_v42, %v4583_v49  ;;  %v3302_v42 = vpack.c.bf16 %v2307_v27, %v2306_v9 }
 0x941   :  { %3527 = vrcp.f32 %v1837_v7 }
 0x942   :  { %v3518_v14 = vpop.eup %3517  ;;  %2997 = vmatprep.mubr.msk.f32.mxu1 %vm69_vm0, %v1860_v17  ;;  %v2499_v17 = vld [vmem:[%s4831_s13] ss:$0 sm:$0xff] }
 0x943   :  { %v3520_v24 = vpop.eup %3519  ;;  %v1846_v0 = vpop.xlane.xlu0 %1845  ;;  %2998 = vmatmul.mubr.msk.f32.gmra.mrb[26].mxu1 %vm69_vm0, %v1862_v35  ;;  %v1866_v2 = vmul.f32 %v3518_v14, %v4591_v38 }
 0x944   :  { %3529 = vrcp.f32 %v1846_v0  ;;  %v1843_v39 = vpop.xlane.xlu1 %1842  ;;  %v1864_v47 = vmul.f32 %v3520_v24, %v4593_v16 }
 0x945   :  { %3531 = vrcp.f32 %v1843_v39 }
 0x946   :  { %v3522_v41 = vpop.eup %3521  ;;  %3000 = vmatprep.mubr.msk.f32.mxu1 %vm69_vm0, %v1864_v47 }
 0x947   :  { %v3524_v49 = vpop.eup %3523  ;;  %3001 = vmatmul.mubr.msk.f32.gmra.mrb[28].mxu1 %vm69_vm0, %v1866_v2  ;;  %v1870_v15 = vmul.f32 %v3522_v41, %v4599_v3 }
 0x948   :  { %v1868_v55 = vmul.f32 %v3524_v49, %v4601_v57 }
 0x94a   :  { %v3526_v63 = vpop.eup %3525  ;;  %3003 = vmatprep.mubr.msk.f32.mxu1 %vm69_vm0, %v1868_v55 }
 0x94b   :  { %v3528_v25 = vpop.eup %3527  ;;  %3004 = vmatmul.mubr.msk.f32.gmra.mrb[30].mxu1 %vm69_vm0, %v1870_v15  ;;  %v1874_v38 = vmul.f32 %v3526_v63, %v4607_v26  ;;  %v2293_v26 = vld [vmem:[%s4830_s11 + $0x8] sm:$0xff] }
 0x94c   :  { %v1872_v16 = vmul.f32 %v3528_v25, %v4609_v19  ;;  %v2292_v19 = vld [vmem:[%s4830_s11] sm:$0xff] }
 0x94d   :  { %v3274_v62 = vpack.c.bf16 %v2293_v26, %v2292_v19 }
 0x94e   :  { %v3530_v1 = vpop.eup %3529  ;;  %3006 = vmatprep.mubr.msk.f32.mxu1 %vm69_vm0, %v1872_v16 }
 0x94f   :  { %v3532_v12 = vpop.eup %3531  ;;  %3007 = vmatmul.mubr.msk.f32.gmra.mrb[32].mxu1 %vm69_vm0, %v1874_v38  ;;  %v1878_v3 = vmul.f32 %v3530_v1, %v4615_v60  ;;  %3275 = vmatprep.subr.bf16.mxu1 %v3274_v62  ;;  %v2295_v60 = vld [vmem:[%s4830_s11 + $0x18] sm:$0xff] }
 0x950   :  { %v1876_v57 = vmul.f32 %v3532_v12, %v4617_v53  ;;  %v2294_v53 = vld [vmem:[%s4830_s11 + $0x10] sm:$0xff] }
 0x951   :  { %v3278_v21 = vpack.c.bf16 %v2295_v60, %v2294_v53 }
 0x952   :  { %3009 = vmatprep.mubr.msk.f32.mxu1 %vm69_vm0, %v1876_v57 }
 0x953   :  { %3010 = vmatmul.mubr.msk.f32.gmra.mrb[34].mxu1 %vm69_vm0, %v1878_v3 }
 0xa0a   :  { %v2990_v18 = vpop.f32.mrb[20].mxu1 }
 0xa0b   :  { %v1993_v50 = vpop.f32.mrb[21].mxu1 }
 0xa0c   :  { %3020 = vmatprep.mubr.msk.f32.mxu1 %vm69_vm0, %v1993_v50 }
 0xa0d   :  { %3021 = vmatmul.mubr.msk.f32.vlgmr.msra.gmra.mrb[36].mxu1 %vm69_vm0, %v2990_v18 }
 0xa0e   :  { %v2993_v31 = vpop.f32.mrb[22].mxu1  ;;  %3277 = vmatpush3.bf16.msra.mxu1 %v3274_v62 }
 0xa0f   :  { %v2003_v43 = vpop.f32.mrb[23].mxu1  ;;  %3279 = vmatprep.subr.bf16.mxu1 %v3278_v21 }
 0xa10   :  { %3023 = vmatprep.mubr.msk.f32.mxu1 %vm69_vm0, %v2003_v43 }
 0xa11   :  { %3024 = vmatmul.mubr.msk.f32.gmra.mrb[38].mxu1 %vm69_vm0, %v2993_v31 }
 0xa12   :  { %v2996_v34 = vpop.f32.mrb[24].mxu1  ;;  %3281 = vmatpush3.bf16.msra.mxu1 %v3278_v21 }
 0xa13   :  { %v2013_v51 = vpop.f32.mrb[25].mxu1  ;;  %3283 = vmatprep.subr.bf16.mxu1 %v3282_v61 }
 0xa14   :  { %3026 = vmatprep.mubr.msk.f32.mxu1 %vm69_vm0, %v2013_v51 }
 0xa15   :  { %3027 = vmatmul.mubr.msk.f32.gmra.mrb[40].mxu1 %vm69_vm0, %v2996_v34 }
 0xa16   :  { %v2999_v22 = vpop.f32.mrb[26].mxu1  ;;  %3285 = vmatpush3.bf16.msra.mxu1 %v3282_v61 }
 0xa17   :  { %v2023_v32 = vpop.f32.mrb[27].mxu1  ;;  %3287 = vmatprep.subr.bf16.mxu1 %v3286_v20 }
 0xa18   :  { %3029 = vmatprep.mubr.msk.f32.mxu1 %vm69_vm0, %v2023_v32 }
 0xa19   :  { %3030 = vmatmul.mubr.msk.f32.gmra.mrb[42].mxu1 %vm69_vm0, %v2999_v22 }
 0xa1a   :  { %v3002_v11 = vpop.f32.mrb[28].mxu1  ;;  %3289 = vmatpush3.bf16.msra.mxu1 %v3286_v20 }
 0xa1b   :  { %v2033_v4 = vpop.f32.mrb[29].mxu1  ;;  %3291 = vmatprep.subr.bf16.mxu1 %v3290_v44 }
 0xa1c   :  { %3032 = vmatprep.mubr.msk.f32.mxu1 %vm69_vm0, %v2033_v4 }
 0xa1d   :  { %3033 = vmatmul.mubr.msk.f32.gmra.mrb[44].mxu1 %vm69_vm0, %v3002_v11 }
 0xa1e   :  { %v3005_v58 = vpop.f32.mrb[30].mxu1  ;;  %3293 = vmatpush3.bf16.msra.mxu1 %v3290_v44 }
 0xa1f   :  { %v2043_v48 = vpop.f32.mrb[31].mxu1  ;;  %3295 = vmatprep.subr.bf16.mxu1 %v3294_v28 }
 0xa20   :  { %3035 = vmatprep.mubr.msk.f32.mxu1 %vm69_vm0, %v2043_v48 }
 0xa21   :  { %3036 = vmatmul.mubr.msk.f32.gmra.mrb[46].mxu1 %vm69_vm0, %v3005_v58 }
 0xa22   :  { %v3008_v46 = vpop.f32.mrb[32].mxu1  ;;  %3297 = vmatpush3.bf16.msra.mxu1 %v3294_v28 }
 0xa23   :  { %v2053_v56 = vpop.f32.mrb[33].mxu1  ;;  %3299 = vmatprep.subr.bf16.mxu1 %v3298_v8 }
 0xa24   :  { %3038 = vmatprep.mubr.msk.f32.mxu1 %vm69_vm0, %v2053_v56 }
 0xa25   :  { %3039 = vmatmul.mubr.msk.f32.gmra.mrb[48].mxu1 %vm69_vm0, %v3008_v46 }
 0xa26   :  { %v3011_v54 = vpop.f32.mrb[34].mxu1  ;;  %3301 = vmatpush3.bf16.msra.mxu1 %v3298_v8 }
 0xa27   :  { %v2063_v7 = vpop.f32.mrb[35].mxu1  ;;  %3303 = vmatprep.subr.bf16.mxu1 %v3302_v42 }
 0xa28   :  { %3041 = vmatprep.mubr.msk.f32.mxu1 %vm69_vm0, %v2063_v7 }
 0xa29   :  { %3042 = vmatmul.mubr.msk.f32.gmra.mrb[50].mxu1 %vm69_vm0, %v3011_v54 }
 0xa2a   :  { %3305 = vmatpush3.bf16.msra.mxu1 %v3302_v42  ;;  %3076 = vmatprep.mubr.f32.mxu1 %v4374_v5 }
 0xa2d   :  { %3077 = vmatmul.mubr.f32.vlgmr.msra.gmra.mrb[52].mxu1 %v4378_v40 }
 0xa2e   :  { %3079 = vmatprep.mubr.f32.mxu1 %v4383_v33 }
 0xa31   :  { %3080 = vmatmul.mubr.f32.gmra.mrb[54].mxu1 %v4387_v23 }
 0xae0   :  { %v3022_v35 = vpop.f32.mrb[36].mxu1 }
 0xae1   :  { %v2203_v14 = vadd.f32 %v3022_v35, %v2499_v17  ;;  %v2197_v24 = vpop.f32.mrb[37].mxu1 }
 0xae2   :  { %v2198_v0 = vadd.f32 %v2499_v17, %v2197_v24 }
 0xae3   :  { %2277 = vst.msk [vmem:[%s4832_s14 + $0x8] sm:$0xff] %vm69_vm0, %v2203_v14 }
 0xae4   :  { %2276 = vst.msk [vmem:[%s4832_s14] sm:$0xff] %vm69_vm0, %v2198_v0  ;;  %v3025_v5 = vpop.f32.mrb[38].mxu1 }
 0xae5   :  { %v2213_v40 = vadd.f32 %v3025_v5, %v2499_v17  ;;  %v2207_v33 = vpop.f32.mrb[39].mxu1 }
 0xae6   :  { %v2208_v23 = vadd.f32 %v2499_v17, %v2207_v33 }
 0xae7   :  { %2279 = vst.msk [vmem:[%s4832_s14 + $0x18] sm:$0xff] %vm69_vm0, %v2213_v40 }
 0xae8   :  { %2278 = vst.msk [vmem:[%s4832_s14 + $0x10] sm:$0xff] %vm69_vm0, %v2208_v23  ;;  %v3028_v39 = vpop.f32.mrb[40].mxu1 }
 0xae9   :  { %v2223_v47 = vadd.f32 %v3028_v39, %v2499_v17  ;;  %v2217_v2 = vpop.f32.mrb[41].mxu1 }
 0xaea   :  { %v2218_v41 = vadd.f32 %v2499_v17, %v2217_v2 }
 0xaeb   :  { %2281 = vst.msk [vmem:[%s4832_s14 + $0x28] sm:$0xff] %vm69_vm0, %v2223_v47 }
 0xaec   :  { %2280 = vst.msk [vmem:[%s4832_s14 + $0x20] sm:$0xff] %vm69_vm0, %v2218_v41  ;;  %v3031_v49 = vpop.f32.mrb[42].mxu1 }
 0xaed   :  { %v2233_v55 = vadd.f32 %v3031_v49, %v2499_v17  ;;  %v2227_v15 = vpop.f32.mrb[43].mxu1 }
 0xaee   :  { %v2228_v63 = vadd.f32 %v2499_v17, %v2227_v15 }
 0xaef   :  { %2283 = vst.msk [vmem:[%s4832_s14 + $0x38] sm:$0xff] %vm69_vm0, %v2233_v55 }
 0xaf0   :  { %2282 = vst.msk [vmem:[%s4832_s14 + $0x30] sm:$0xff] %vm69_vm0, %v2228_v63  ;;  %v3034_v25 = vpop.f32.mrb[44].mxu1 }
 0xaf1   :  { %v2243_v16 = vadd.f32 %v3034_v25, %v2499_v17  ;;  %v2237_v38 = vpop.f32.mrb[45].mxu1 }
 0xaf2   :  { %v2238_v1 = vadd.f32 %v2499_v17, %v2237_v38 }
 0xaf3   :  { %2285 = vst.msk [vmem:[%s4832_s14 + $0x48] sm:$0xff] %vm69_vm0, %v2243_v16 }
 0xaf4   :  { %2284 = vst.msk [vmem:[%s4832_s14 + $0x40] sm:$0xff] %vm69_vm0, %v2238_v1  ;;  %v3037_v12 = vpop.f32.mrb[46].mxu1 }
 0xaf5   :  { %v2253_v57 = vadd.f32 %v3037_v12, %v2499_v17  ;;  %v2247_v3 = vpop.f32.mrb[47].mxu1 }
 0xaf6   :  { %v2248_v19 = vadd.f32 %v2499_v17, %v2247_v3 }
 0xaf7   :  { %2287 = vst.msk [vmem:[%s4832_s14 + $0x58] sm:$0xff] %vm69_vm0, %v2253_v57 }
 0xaf8   :  { %2286 = vst.msk [vmem:[%s4832_s14 + $0x50] sm:$0xff] %vm69_vm0, %v2248_v19  ;;  %v3040_v26 = vpop.f32.mrb[48].mxu1 }
 0xaf9   :  { %v2263_v62 = vadd.f32 %v3040_v26, %v2499_v17  ;;  %v2257_v53 = vpop.f32.mrb[49].mxu1 }
 0xafa   :  { %v2258_v60 = vadd.f32 %v2499_v17, %v2257_v53 }
 0xafb   :  { %2289 = vst.msk [vmem:[%s4832_s14 + $0x68] sm:$0xff] %vm69_vm0, %v2263_v62 }
 0xafc   :  { %2288 = vst.msk [vmem:[%s4832_s14 + $0x60] sm:$0xff] %vm69_vm0, %v2258_v60  ;;  %v3043_v18 = vpop.f32.mrb[50].mxu1 }
 0xafd   :  { %v2273_v50 = vadd.f32 %v3043_v18, %v2499_v17  ;;  %v2267_v21 = vpop.f32.mrb[51].mxu1 }
 0xafe   :  { %v2268_v52 = vadd.f32 %v2499_v17, %v2267_v21 }
 0xaff   :  { %2291 = vst.msk [vmem:[%s4832_s14 + $0x78] sm:$0xff] %vm69_vm0, %v2273_v50 }
 0xb00   :  { %2290 = vst.msk [vmem:[%s4832_s14 + $0x70] sm:$0xff] %vm69_vm0, %v2268_v52  ;;  %v3078_v45 = vpop.f32.mrb[52].mxu1 }
 0xb01   :  { %2394 = vst.msk [vmem:[%s4833_s15 + $0x8] sm:$0xff] %vm997_vm4, %v3078_v45  ;;  %v2374_v31 = vpop.f32.mrb[53].mxu1 }
 0xb02   :  { %2393 = vst.msk [vmem:[%s4833_s15] sm:$0xff] %vm997_vm4, %v2374_v31 }
 0xb04   :  { %v3081_v43 = vpop.f32.mrb[54].mxu1 }
 0xb05   :  { %2396 = vst.msk [vmem:[%s4833_s15 + $0x18] sm:$0xff] %vm997_vm4, %v3081_v43  ;;  %v2384_v61 = vpop.f32.mrb[55].mxu1 }
 0xb06   :  { %2395 = vst.msk [vmem:[%s4833_s15 + $0x10] sm:$0xff] %vm997_vm4, %v2384_v61 }

</bundles_post_ra>
